<compile_context>
chip_gen: v7x
topology: tpu7x:2x2x1
jax: 0.10.0
libtpu: 0.0.40
codegen_flags: <defaults>
</compile_context>

<pallas_src>
import functools

import jax
import jax.numpy as jnp
from jax.experimental import pallas as pl
from jax.experimental.pallas import tpu as pltpu

FEATURES = 1792   # in_features of nn.Linear in Net.__init__
CLASSES = 102     # default CLASS


def _head_kernel(x_ref, m_ref, w_ref, b_ref, o_ref, acc_ref, *, inv_hw):
    """One (batch-tile, channel-tile) grid step.

    x_ref  : (tile_n, tile_c, HW)   backbone feature chunk (NCHW, HW flattened)
    m_ref  : (tile_n, tile_c)       dropout mask chunk, values in {0, 1/keep_prob}
    w_ref  : (tile_c, CLASSES)      fc weight chunk
    b_ref  : (1, CLASSES)           fc bias
    o_ref  : (tile_n, CLASSES)      logits (written on the last channel step)
    acc_ref: (tile_n, CLASSES) f32  partial pooled @ W accumulator
    """
    c = pl.program_id(1)

    @pl.when(c == 0)
    def _init():
        acc_ref[...] = jnp.zeros_like(acc_ref)

    # AdaptiveAvgPool2d((1,1)) + flatten(1): mean over the spatial (lane) axis.
    pooled = jnp.sum(x_ref[...].astype(jnp.float32), axis=-1) * inv_hw

    # Dropout(p=0.5): inverted scaling baked into the mask (mask==1.0 in eval).
    # Applying it per channel chunk before the partial matmul is exact because
    # the mask is elementwise on pooled (N, C) and the matmul sums over C.
    pooled = pooled * m_ref[...]

    # Partial Linear(1792 -> 102): accumulate this channel chunk on the MXU.
    acc_ref[...] += jnp.dot(pooled, w_ref[...].astype(jnp.float32),
                            preferred_element_type=jnp.float32)

    @pl.when(c == pl.num_programs(1) - 1)
    def _finalize():
        o_ref[...] = (acc_ref[...] + b_ref[...]).astype(o_ref.dtype)


def net_head_forward(x_nchw, w, b, key, train_flag="train",
                     *, tile_n=None, tile_c=256):
    """Fused avgpool + dropout + fc head of `Net`.

    x_nchw : (N, 1792, H, W) backbone feature map (NCHW, as PyTorch produces).
    w      : (1792, CLASSES) fc weight (transposed vs. PyTorch's (out, in)).
    b      : (CLASSES,)      fc bias.
    key    : jax PRNG key used for the dropout mask (train mode only).
    """
    N, C, H, W = x_nchw.shape
    assert C == FEATURES
    HW = H * W

    # Free, contiguous reshape -- no HBM transpose.
    x = x_nchw.reshape(N, C, HW)

    if tile_n is None:
        tile_n = 8 if N % 8 == 0 else N
    assert N % tile_n == 0, "batch tile must divide N"
    assert C % tile_c == 0 and tile_c % 8 == 0

    keep_prob = 0.5
    if train_flag == "train":
        keep = jax.random.bernoulli(key, keep_prob, (N, C))
        mask = keep.astype(jnp.float32) * (1.0 / keep_prob)
    else:
        mask = jnp.ones((N, C), jnp.float32)   # identity: no dropout in eval

    b2 = b.reshape(1, CLASSES).astype(jnp.float32)

    kernel = functools.partial(_head_kernel, inv_hw=1.0 / float(HW))
    grid = (N // tile_n, C // tile_c)

    return pl.pallas_call(
        kernel,
        out_shape=jax.ShapeDtypeStruct((N, CLASSES), jnp.float32),
        grid=grid,
        in_specs=[
            pl.BlockSpec((tile_n, tile_c, HW), lambda i, c: (i, c, 0)),  # x
            pl.BlockSpec((tile_n, tile_c), lambda i, c: (i, c)),         # mask
            pl.BlockSpec((tile_c, CLASSES), lambda i, c: (c, 0)),        # w
            pl.BlockSpec((1, CLASSES), lambda i, c: (0, 0)),             # b
        ],
        out_specs=pl.BlockSpec((tile_n, CLASSES), lambda i, c: (i, 0)),
        scratch_shapes=[pltpu.VMEM((tile_n, CLASSES), jnp.float32)],
        compiler_params=pltpu.CompilerParams(
            dimension_semantics=("parallel", "arbitrary")),
    )(x, mask, w, b2)


if __name__ == "__main__":
    root = jax.random.PRNGKey(0)
    k_x, k_w, k_b, k_drop = jax.random.split(root, 4)

    # Small synthetic backbone feature map: batch=2, C=1792 (fixed by the fc
    # layer's in_features), spatial 4x4.
    N, H, W = 2, 4, 4
    x = jax.random.normal(k_x, (N, FEATURES, H, W), dtype=jnp.float32)

    # Deterministic Linear(1792, 102) parameters (PyTorch-style uniform init).
    bound = 1.0 / (FEATURES ** 0.5)
    w = jax.random.uniform(k_w, (FEATURES, CLASSES), jnp.float32, -bound, bound)
    b = jax.random.uniform(k_b, (CLASSES,), jnp.float32, -bound, bound)

    pooled_ref = jnp.mean(x, axis=(2, 3))                       # (N, 1792)

    # --- eval path: no dropout, check against pure-JAX reference ---
    out_eval = jax.block_until_ready(
        net_head_forward(x, w, b, k_drop, train_flag="eval"))
    ref_eval = pooled_ref @ w + b
    assert out_eval.shape == (N, CLASSES)
    assert jnp.allclose(out_eval, ref_eval, atol=1e-4, rtol=1e-4)

    # --- train path: dropout(p=0.5) with the same mask the wrapper builds ---
    out_train = jax.block_until_ready(
        net_head_forward(x, w, b, k_drop, train_flag="train"))
    keep = jax.random.bernoulli(k_drop, 0.5, (N, FEATURES))
    ref_train = (pooled_ref * keep.astype(jnp.float32) * 2.0) @ w + b
    assert out_train.shape == (N, CLASSES)
    assert jnp.allclose(out_train, ref_train, atol=1e-4, rtol=1e-4)

    print("KERNEL_OK")
</pallas_src>

<mosaic_0001>
module attributes {stable_mosaic.version = 11 : i64} {
  func.func @_head_kernel(%arg0: i32, %arg1: i32, %arg2: memref<2x256x16xf32, #tpu.memory_space<vmem>>, %arg3: memref<2x256xf32, #tpu.memory_space<vmem>>, %arg4: memref<256x102xf32, #tpu.memory_space<vmem>>, %arg5: memref<1x102xf32, #tpu.memory_space<vmem>>, %arg6: memref<2x102xf32, #tpu.memory_space<vmem>>, %arg7: memref<2x102xf32, #tpu.memory_space<vmem>>) attributes {dimension_semantics = [#tpu.dimension_semantics<parallel>, #tpu.dimension_semantics<arbitrary>], iteration_bounds = array<i64: 1, 7>, scalar_prefetch = 0 : i64, scratch_operands = 1 : i64, tpu.core_type = #tpu.core_type<tc>, window_params = [{transform_indices = @transform_0, window_bounds = array<i64: 2, 256, 16>}, {transform_indices = @transform_1, window_bounds = array<i64: 2, 256>}, {transform_indices = @transform_2, window_bounds = array<i64: 256, 102>}, {pipeline_mode = #tpu.pipeline_mode<synchronous>, transform_indices = @transform_3, window_bounds = array<i64: 1, 102>}, {transform_indices = @transform_4, window_bounds = array<i64: 2, 102>}]} {
    %c0_i32 = arith.constant 0 : i32
    %0 = arith.cmpi eq, %arg1, %c0_i32 : i32
    %1 = arith.extui %0 : i1 to i32
    %c0_i32_0 = arith.constant 0 : i32
    %2 = arith.cmpi ne, %1, %c0_i32_0 : i32
    scf.if %2 {
      %cst_14 = arith.constant 0.000000e+00 : f32
      %17 = vector.broadcast %cst_14 : f32 to vector<2x102xf32>
      %c0_15 = arith.constant 0 : index
      %c0_16 = arith.constant 0 : index
      %18 = vector.load %arg7[%c0_15, %c0_16] : memref<2x102xf32, #tpu.memory_space<vmem>>, vector<2x102xf32>
      tpu.vector_store %arg7[%c0_15, %c0_16], %17 {strides = array<i32>} : memref<2x102xf32, #tpu.memory_space<vmem>>, vector<2x102xf32>,
    } else {
    }
    %c0 = arith.constant 0 : index
    %c0_1 = arith.constant 0 : index
    %c0_2 = arith.constant 0 : index
    %3 = vector.load %arg2[%c0, %c0_1, %c0_2] : memref<2x256x16xf32, #tpu.memory_space<vmem>>, vector<2x256x16xf32>
    %cst = arith.constant dense<0.000000e+00> : vector<2x256xf32>
    %4 = vector.multi_reduction <add>, %3, %cst [2] : vector<2x256x16xf32> to vector<2x256xf32>
    %cst_3 = arith.constant 6.250000e-02 : f32
    %5 = vector.broadcast %cst_3 : f32 to vector<2x256xf32>
    %6 = arith.mulf %4, %5 : vector<2x256xf32>
    %c0_4 = arith.constant 0 : index
    %c0_5 = arith.constant 0 : index
    %7 = vector.load %arg3[%c0_4, %c0_5] : memref<2x256xf32, #tpu.memory_space<vmem>>, vector<2x256xf32>
    %8 = arith.mulf %6, %7 : vector<2x256xf32>
    %c0_6 = arith.constant 0 : index
    %c0_7 = arith.constant 0 : index
    %9 = vector.load %arg7[%c0_6, %c0_7] : memref<2x102xf32, #tpu.memory_space<vmem>>, vector<2x102xf32>
    %c0_8 = arith.constant 0 : index
    %c0_9 = arith.constant 0 : index
    %10 = vector.load %arg4[%c0_8, %c0_9] : memref<256x102xf32, #tpu.memory_space<vmem>>, vector<256x102xf32>
    %cst_10 = arith.constant dense<0.000000e+00> : vector<2x102xf32>
    %11 = tpu.matmul %8, %10, %cst_10 {dimension_numbers = #tpu.dot_dimension_numbers<[1], [0], [0], [1], [0, 0, 1, 1], [], []>} : vector<2x256xf32>, vector<256x102xf32>, vector<2x102xf32> -> vector<2x102xf32>
    %12 = arith.addf %9, %11 : vector<2x102xf32>
    %c0_11 = arith.constant 0 : index
    %c0_12 = arith.constant 0 : index
    %13 = vector.load %arg7[%c0_11, %c0_12] : memref<2x102xf32, #tpu.memory_space<vmem>>, vector<2x102xf32>
    tpu.vector_store %arg7[%c0_11, %c0_12], %12 {strides = array<i32>} : memref<2x102xf32, #tpu.memory_space<vmem>>, vector<2x102xf32>,
    %c6_i32 = arith.constant 6 : i32
    %14 = arith.cmpi eq, %arg1, %c6_i32 : i32
    %15 = arith.extui %14 : i1 to i32
    %c0_i32_13 = arith.constant 0 : i32
    %16 = arith.cmpi ne, %15, %c0_i32_13 : i32
    scf.if %16 {
      %c0_14 = arith.constant 0 : index
      %c0_15 = arith.constant 0 : index
      %17 = vector.load %arg7[%c0_14, %c0_15] : memref<2x102xf32, #tpu.memory_space<vmem>>, vector<2x102xf32>
      %c0_16 = arith.constant 0 : index
      %c0_17 = arith.constant 0 : index
      %18 = vector.load %arg5[%c0_16, %c0_17] : memref<1x102xf32, #tpu.memory_space<vmem>>, vector<1x102xf32>
      %19 = vector.broadcast %18 : vector<1x102xf32> to vector<2x102xf32>
      %20 = arith.addf %17, %19 : vector<2x102xf32>
      %c0_18 = arith.constant 0 : index
      %c0_19 = arith.constant 0 : index
      %21 = vector.load %arg6[%c0_18, %c0_19] : memref<2x102xf32, #tpu.memory_space<vmem>>, vector<2x102xf32>
      tpu.vector_store %arg6[%c0_18, %c0_19], %20 {strides = array<i32>} : memref<2x102xf32, #tpu.memory_space<vmem>>, vector<2x102xf32>,
    } else {
    }
    return
  }
  func.func @transform_0(%arg0: i32, %arg1: i32) -> (i32, i32, i32) {
    %c0_i32 = arith.constant 0 : i32
    %c0_i32_0 = arith.constant 0 : i32
    return %arg0, %arg1, %c0_i32 : i32, i32, i32
  }
  func.func @transform_1(%arg0: i32, %arg1: i32) -> (i32, i32) {
    %c0_i32 = arith.constant 0 : i32
    return %arg0, %arg1 : i32, i32
  }
  func.func @transform_2(%arg0: i32, %arg1: i32) -> (i32, i32) {
    %c0_i32 = arith.constant 0 : i32
    %c0_i32_0 = arith.constant 0 : i32
    return %arg1, %c0_i32 : i32, i32
  }
  func.func @transform_3(%arg0: i32, %arg1: i32) -> (i32, i32) {
    %c0_i32 = arith.constant 0 : i32
    %c0_i32_0 = arith.constant 0 : i32
    %c0_i32_1 = arith.constant 0 : i32
    return %c0_i32, %c0_i32_0 : i32, i32
  }
  func.func @transform_4(%arg0: i32, %arg1: i32) -> (i32, i32) {
    %c0_i32 = arith.constant 0 : i32
    %c0_i32_0 = arith.constant 0 : i32
    return %arg0, %c0_i32 : i32, i32
  }
}

</mosaic_0001>

<bundles_post_ra>
// kernel: tpu_custom_call.1
= control target key start
LH: loop header
LB: loop body
LE: loop exit
PB: predicated region body
PF: predicated region fallthrough
CT: control target
= control target key end

     0   :  { %9 = vsyncpa [#allocation5], 0  ;;  %s2510_s15 = smov 0   ;;  %s2512_s16 = smov 0   ;;  %s3439_s0 = inlined_call_operand.vmem [shape: f32[2,1792,16], index: 0, kind: input, shape index: {}]   ;;  %s3440_s1 = inlined_call_operand.vmem [shape: f32[2,1792], index: 1, kind: input, shape index: {}]   ;;  %s3441_s2 = inlined_call_operand.vmem [shape: f32[1792,102], index: 2, kind: input, shape index: {}]   ;;  %s3442_s3 = inlined_call_operand.vmem [shape: f32[1,102], index: 3, kind: input, shape index: {}]   ;;  %s3443_s4 = inlined_call_operand.hbm [shape: f32[2,102], index: 4, kind: output, shape index: {}]  }
   0x1   :  { %s2514_s17 = smov 0   ;;  %s2516_s18 = smov 0  }
   0x2   :  { %s2518_s19 = smov 0  }
   0x3 LB: > { %s2113_s20 = sadd.s32 4294967295, %s2480_s19   ;;  %s24_s21 = sadd.s32 1, %s2476_s18  ;;  %s2480_s19 = sphi %s2518_s19, %s15_s19   ;;  %s2476_s18 = sphi %s2516_s18, %s3516_s18   ;;  %s2472_s17 = sphi %s2514_s17, %s3515_s17   ;;  %s2468_s16 = sphi %s2512_s16, %s3514_s16   ;;  %s2464_s15 = sphi %s2510_s15, %s3513_s15  }
   0x4   : > { %p25_p0 = scmp.ge.s32.totalorder %s24_s21, 7  ;;  %p43_p1 = scmp.ne.s32.totalorder %s2468_s16, %s2464_s15 }
   0x5   : > { %p44_p2 = scmp.eq.s32.totalorder %s2480_s19, 0  ;;  %s36_s23 = sadd.s32 1, %s2468_s16 }
   0x6   : > { %s3518_s21 = smov (%p25_p0, %s24_s21), 0  ;;  %p2115_p5 = scmp.ge.s32.totalorder %s2480_s19, 7 }
   0x7   : > { %p45_p3 = por %p44_p2, %p43_p1  ;;  %s32_s22 = ssub.s32 %s2476_s18, %s3518_s21 }
   0x8   : > { %p34_p4 = scmp.eq.s32.totalorder %s32_s22, 0  ;;  %173 = sbr.rel (%p2115_p5) target bundleno = 51 (0x33), region = 20 }
   0xa   : > { %s2546_s24 = scalar_select %p34_p4, %s2468_s16, %s36_s23  }
   0xf   : > { %176 = sbr.rel (!%p45_p3) target bundleno = 51 (0x33), region = 24  ;;  %s178_s25 = sand.u32 (%p45_p3), 1, %s2468_s16  }
  0x10   : > { %s2133_s26 = sshll.u32 (%p45_p3), %s2476_s18, 8  ;;  %s2116_s27 = sshll.u32 (%p45_p3), %s178_s25, 9 }
  0x11   : > { %s2554_s30 = scalar_lea.vmem (%p45_p3), %s3439_s0, %s2133_s26  ;;  %s2559_s5 = scalar_lea.vmem (%p45_p3), [#allocation3], %s2116_s27 }
  0x12   : > { %v340_v0 = vld [vmem:[%s2554_s30] sm:$0xff] (%p45_p3)  ;;  %v342_v1 = vld [vmem:[%s2554_s30 + $0x8] sm:$0xff] (%p45_p3)  ;;  %v344_v2 = vld [vmem:[%s2554_s30 + $0x10] sm:$0xff] (%p45_p3) }
  0x13   : > { %341 = vst [vmem:[%s2559_s5] sm:$0xff] (%p45_p3), %v340_v0  ;;  %343 = vst [vmem:[%s2559_s5 + $0x8] sm:$0xff] (%p45_p3), %v342_v1  ;;  %v346_v3 = vld [vmem:[%s2554_s30 + $0x18] sm:$0xff] (%p45_p3)  ;;  %v348_v4 = vld [vmem:[%s2554_s30 + $0x20] sm:$0xff] (%p45_p3) }
  0x14   : > { %345 = vst [vmem:[%s2559_s5 + $0x10] sm:$0xff] (%p45_p3), %v344_v2  ;;  %v350_v5 = vld [vmem:[%s2554_s30 + $0x28] sm:$0xff] (%p45_p3)  ;;  %347 = vst [vmem:[%s2559_s5 + $0x18] sm:$0xff] (%p45_p3), %v346_v3  ;;  %v352_v6 = vld [vmem:[%s2554_s30 + $0x30] sm:$0xff] (%p45_p3) }
  0x15   : > { %349 = vst [vmem:[%s2559_s5 + $0x20] sm:$0xff] (%p45_p3), %v348_v4  ;;  %351 = vst [vmem:[%s2559_s5 + $0x28] sm:$0xff] (%p45_p3), %v350_v5  ;;  %v354_v7 = vld [vmem:[%s2554_s30 + $0x38] sm:$0xff] (%p45_p3)  ;;  %v356_v8 = vld [vmem:[%s2554_s30 + $0x40] sm:$0xff] (%p45_p3) }
  0x16   : > { %353 = vst [vmem:[%s2559_s5 + $0x30] sm:$0xff] %v352_v6  ;;  %355 = vst [vmem:[%s2559_s5 + $0x38] sm:$0xff] %v354_v7  ;;  %v358_v9 = vld [vmem:[%s2554_s30 + $0x48] sm:$0xff]  ;;  %v360_v10 = vld [vmem:[%s2554_s30 + $0x50] sm:$0xff] }
  0x17   : > { %357 = vst [vmem:[%s2559_s5 + $0x40] sm:$0xff] %v356_v8  ;;  %v362_v11 = vld [vmem:[%s2554_s30 + $0x58] sm:$0xff]  ;;  %359 = vst [vmem:[%s2559_s5 + $0x48] sm:$0xff] %v358_v9  ;;  %v364_v12 = vld [vmem:[%s2554_s30 + $0x60] sm:$0xff] }
  0x18   : > { %361 = vst [vmem:[%s2559_s5 + $0x50] sm:$0xff] %v360_v10  ;;  %363 = vst [vmem:[%s2559_s5 + $0x58] sm:$0xff] %v362_v11  ;;  %v366_v13 = vld [vmem:[%s2554_s30 + $0x68] sm:$0xff]  ;;  %v368_v14 = vld [vmem:[%s2554_s30 + $0x70] sm:$0xff] }
  0x19   : > { %365 = vst [vmem:[%s2559_s5 + $0x60] sm:$0xff] %v364_v12  ;;  %367 = vst [vmem:[%s2559_s5 + $0x68] sm:$0xff] %v366_v13  ;;  %v370_v15 = vld [vmem:[%s2554_s30 + $0x78] sm:$0xff]  ;;  %v372_v16 = vld [vmem:[%s2554_s30 + $0x80] sm:$0xff] }
  0x1a   : > { %369 = vst [vmem:[%s2559_s5 + $0x70] sm:$0xff] %v368_v14  ;;  %v374_v17 = vld [vmem:[%s2554_s30 + $0x88] sm:$0xff]  ;;  %371 = vst [vmem:[%s2559_s5 + $0x78] sm:$0xff] %v370_v15  ;;  %v376_v18 = vld [vmem:[%s2554_s30 + $0x90] sm:$0xff] }
  0x1b   : > { %373 = vst [vmem:[%s2559_s5 + $0x80] sm:$0xff] %v372_v16  ;;  %375 = vst [vmem:[%s2559_s5 + $0x88] sm:$0xff] %v374_v17  ;;  %v378_v19 = vld [vmem:[%s2554_s30 + $0x98] sm:$0xff]  ;;  %v380_v20 = vld [vmem:[%s2554_s30 + $0xa0] sm:$0xff] }
  0x1c   : > { %377 = vst [vmem:[%s2559_s5 + $0x90] sm:$0xff] %v376_v18  ;;  %379 = vst [vmem:[%s2559_s5 + $0x98] sm:$0xff] %v378_v19  ;;  %v382_v21 = vld [vmem:[%s2554_s30 + $0xa8] sm:$0xff]  ;;  %v384_v22 = vld [vmem:[%s2554_s30 + $0xb0] sm:$0xff] }
  0x1d   : > { %381 = vst [vmem:[%s2559_s5 + $0xa0] sm:$0xff] %v380_v20  ;;  %v386_v23 = vld [vmem:[%s2554_s30 + $0xb8] sm:$0xff]  ;;  %383 = vst [vmem:[%s2559_s5 + $0xa8] sm:$0xff] %v382_v21  ;;  %v388_v24 = vld [vmem:[%s2554_s30 + $0xc0] sm:$0xff] }
  0x1e   : > { %385 = vst [vmem:[%s2559_s5 + $0xb0] sm:$0xff] %v384_v22  ;;  %387 = vst [vmem:[%s2559_s5 + $0xb8] sm:$0xff] %v386_v23  ;;  %v390_v25 = vld [vmem:[%s2554_s30 + $0xc8] sm:$0xff]  ;;  %v392_v26 = vld [vmem:[%s2554_s30 + $0xd0] sm:$0xff] }
  0x1f   : > { %389 = vst [vmem:[%s2559_s5 + $0xc0] sm:$0xff] %v388_v24  ;;  %391 = vst [vmem:[%s2559_s5 + $0xc8] sm:$0xff] %v390_v25  ;;  %v394_v27 = vld [vmem:[%s2554_s30 + $0xd8] sm:$0xff]  ;;  %v396_v28 = vld [vmem:[%s2554_s30 + $0xe0] sm:$0xff] }
  0x20   : > { %393 = vst [vmem:[%s2559_s5 + $0xd0] sm:$0xff] %v392_v26  ;;  %v398_v29 = vld [vmem:[%s2554_s30 + $0xe8] sm:$0xff]  ;;  %395 = vst [vmem:[%s2559_s5 + $0xd8] sm:$0xff] %v394_v27  ;;  %v400_v30 = vld [vmem:[%s2554_s30 + $0xf0] sm:$0xff] }
  0x21   : > { %397 = vst [vmem:[%s2559_s5 + $0xe0] sm:$0xff] %v396_v28  ;;  %399 = vst [vmem:[%s2559_s5 + $0xe8] sm:$0xff] %v398_v29  ;;  %v402_v31 = vld [vmem:[%s2554_s30 + $0xf8] sm:$0xff]  ;;  %v404_v32 = vld [vmem:[%s2554_s30 + $0x700] sm:$0xff] }
  0x22   : > { %401 = vst [vmem:[%s2559_s5 + $0xf0] sm:$0xff] %v400_v30  ;;  %403 = vst [vmem:[%s2559_s5 + $0xf8] sm:$0xff] %v402_v31  ;;  %v406_v33 = vld [vmem:[%s2554_s30 + $0x708] sm:$0xff]  ;;  %v408_v34 = vld [vmem:[%s2554_s30 + $0x710] sm:$0xff] }
  0x23   : > { %405 = vst [vmem:[%s2559_s5 + $0x100] sm:$0xff] %v404_v32  ;;  %v410_v35 = vld [vmem:[%s2554_s30 + $0x718] sm:$0xff]  ;;  %407 = vst [vmem:[%s2559_s5 + $0x108] sm:$0xff] %v406_v33  ;;  %v412_v36 = vld [vmem:[%s2554_s30 + $0x720] sm:$0xff] }
  0x24   : > { %409 = vst [vmem:[%s2559_s5 + $0x110] sm:$0xff] %v408_v34  ;;  %411 = vst [vmem:[%s2559_s5 + $0x118] sm:$0xff] %v410_v35  ;;  %v414_v37 = vld [vmem:[%s2554_s30 + $0x728] sm:$0xff]  ;;  %v416_v38 = vld [vmem:[%s2554_s30 + $0x730] sm:$0xff] }
  0x25   : > { %413 = vst [vmem:[%s2559_s5 + $0x120] sm:$0xff] %v412_v36  ;;  %415 = vst [vmem:[%s2559_s5 + $0x128] sm:$0xff] %v414_v37  ;;  %v418_v39 = vld [vmem:[%s2554_s30 + $0x738] sm:$0xff]  ;;  %v420_v40 = vld [vmem:[%s2554_s30 + $0x740] sm:$0xff] }
  0x26   : > { %417 = vst [vmem:[%s2559_s5 + $0x130] sm:$0xff] %v416_v38  ;;  %v422_v41 = vld [vmem:[%s2554_s30 + $0x748] sm:$0xff]  ;;  %419 = vst [vmem:[%s2559_s5 + $0x138] sm:$0xff] %v418_v39  ;;  %v424_v42 = vld [vmem:[%s2554_s30 + $0x750] sm:$0xff] }
  0x27   : > { %421 = vst [vmem:[%s2559_s5 + $0x140] sm:$0xff] %v420_v40  ;;  %423 = vst [vmem:[%s2559_s5 + $0x148] sm:$0xff] %v422_v41  ;;  %v426_v43 = vld [vmem:[%s2554_s30 + $0x758] sm:$0xff]  ;;  %v428_v44 = vld [vmem:[%s2554_s30 + $0x760] sm:$0xff] }
  0x28   : > { %425 = vst [vmem:[%s2559_s5 + $0x150] sm:$0xff] %v424_v42  ;;  %427 = vst [vmem:[%s2559_s5 + $0x158] sm:$0xff] %v426_v43  ;;  %v430_v45 = vld [vmem:[%s2554_s30 + $0x768] sm:$0xff]  ;;  %v432_v46 = vld [vmem:[%s2554_s30 + $0x770] sm:$0xff] }
  0x29   : > { %429 = vst [vmem:[%s2559_s5 + $0x160] sm:$0xff] %v428_v44  ;;  %v434_v47 = vld [vmem:[%s2554_s30 + $0x778] sm:$0xff]  ;;  %431 = vst [vmem:[%s2559_s5 + $0x168] sm:$0xff] %v430_v45  ;;  %v436_v48 = vld [vmem:[%s2554_s30 + $0x780] sm:$0xff] }
  0x2a   : > { %433 = vst [vmem:[%s2559_s5 + $0x170] sm:$0xff] %v432_v46  ;;  %435 = vst [vmem:[%s2559_s5 + $0x178] sm:$0xff] %v434_v47  ;;  %v438_v49 = vld [vmem:[%s2554_s30 + $0x788] sm:$0xff]  ;;  %v440_v50 = vld [vmem:[%s2554_s30 + $0x790] sm:$0xff] }
  0x2b   : > { %437 = vst [vmem:[%s2559_s5 + $0x180] sm:$0xff] %v436_v48  ;;  %439 = vst [vmem:[%s2559_s5 + $0x188] sm:$0xff] %v438_v49  ;;  %v442_v51 = vld [vmem:[%s2554_s30 + $0x798] sm:$0xff]  ;;  %v444_v52 = vld [vmem:[%s2554_s30 + $0x7a0] sm:$0xff] }
  0x2c   : > { %441 = vst [vmem:[%s2559_s5 + $0x190] sm:$0xff] %v440_v50  ;;  %v446_v53 = vld [vmem:[%s2554_s30 + $0x7a8] sm:$0xff]  ;;  %443 = vst [vmem:[%s2559_s5 + $0x198] sm:$0xff] %v442_v51  ;;  %v448_v54 = vld [vmem:[%s2554_s30 + $0x7b0] sm:$0xff] }
  0x2d   : > { %445 = vst [vmem:[%s2559_s5 + $0x1a0] sm:$0xff] %v444_v52  ;;  %447 = vst [vmem:[%s2559_s5 + $0x1a8] sm:$0xff] %v446_v53  ;;  %v450_v55 = vld [vmem:[%s2554_s30 + $0x7b8] sm:$0xff]  ;;  %v452_v56 = vld [vmem:[%s2554_s30 + $0x7c0] sm:$0xff] }
  0x2e   : > { %449 = vst [vmem:[%s2559_s5 + $0x1b0] sm:$0xff] %v448_v54  ;;  %451 = vst [vmem:[%s2559_s5 + $0x1b8] sm:$0xff] %v450_v55  ;;  %v454_v57 = vld [vmem:[%s2554_s30 + $0x7c8] sm:$0xff]  ;;  %v456_v58 = vld [vmem:[%s2554_s30 + $0x7d0] sm:$0xff] }
  0x2f   : > { %453 = vst [vmem:[%s2559_s5 + $0x1c0] sm:$0xff] %v452_v56  ;;  %v458_v59 = vld [vmem:[%s2554_s30 + $0x7d8] sm:$0xff]  ;;  %455 = vst [vmem:[%s2559_s5 + $0x1c8] sm:$0xff] %v454_v57  ;;  %v460_v60 = vld [vmem:[%s2554_s30 + $0x7e0] sm:$0xff] }
  0x30   : > { %457 = vst [vmem:[%s2559_s5 + $0x1d0] sm:$0xff] %v456_v58  ;;  %459 = vst [vmem:[%s2559_s5 + $0x1d8] sm:$0xff] %v458_v59  ;;  %v462_v61 = vld [vmem:[%s2554_s30 + $0x7e8] sm:$0xff]  ;;  %v464_v62 = vld [vmem:[%s2554_s30 + $0x7f0] sm:$0xff] }
  0x31   : > { %461 = vst [vmem:[%s2559_s5 + $0x1e0] sm:$0xff] %v460_v60  ;;  %463 = vst [vmem:[%s2559_s5 + $0x1e8] sm:$0xff] %v462_v61  ;;  %v466_v63 = vld [vmem:[%s2554_s30 + $0x7f8] sm:$0xff] }
  0x32   : > { %465 = vst [vmem:[%s2559_s5 + $0x1f0] sm:$0xff] %v464_v62  ;;  %467 = vst [vmem:[%s2559_s5 + $0x1f8] sm:$0xff] %v466_v63 }
  0x33 PF: > { %p2119_p6 = scmp.ge.s32.totalorder %s2480_s19, 1  ;;  %p494_p7 = scmp.lt.s32.totalorder %s2480_s19, 8 }
  0x35   : > { %p495_p8 = pnand %p2119_p6, %p494_p7 }
  0x37   : > { %498 = sbr.rel (%p495_p8) target bundleno = 866 (0x362), region = 70 }
  0x3e   : > { %s501_s6 = sand.u32 1, %s2464_s15   ;;  %s2121_s7 = sshll.u32 %s2472_s17, 1 }
  0x3f   : > { %s2120_s8 = sshll.u32 %s501_s6, 9  ;;  %p540_p9 = scmp.lt.s32.totalorder %s2121_s7, 13 }
  0x40   : > { %s2123_s9 = sshll.u32 %s2472_s17, 5  ;;  %s2701_s15 = scalar_lea.vmem [#allocation3], %s2120_s8 }
  0x41   : > { %s3520_s7 = smov (!%p540_p9, %s2121_s7), 13  ;;  %p548_p10 = scmp.lt.s32.totalorder %s2123_s9, 223 }
  0x42   : > { %s2122_s10 = sshll.u32 %s3520_s7, 1  ;;  %p2125_p11 = scmp.ne.s32.totalorder %s2472_s17, 0 }
  0x43   : > { %s2694_s13 = scalar_lea.vmem %s3440_s1, %s2122_s10  ;;  %s3522_s9 = smov (!%p548_p10, %s2123_s9), 223  ;;  %vm557_vm0 = vcmask (!%p2125_p11), 828416   ;;  %v2482_v0 = vmov (!%p2125_p11), 0.0  }
  0x44   : > { %s2124_s14 = sshll.u32 %s3522_s9, 3  ;;  %556 = sbr.rel (%p2125_p11) target bundleno = 75 (0x4b), region = 78  ;;  %558 = vst.msk [vmem:[#allocation2] sm:$0x3] (!%p2125_p11), %vm557_vm0, %v2482_v0 }
  0x45   : > { %s2699_s25 = scalar_lea.vmem %s3441_s2, %s2124_s14 }
  0x4b PF: > { %v561_v1 = vld [vmem:[%s2701_s15 + $0x10] sm:$0xff]  ;;  %vm623_vm1 = vcmask 130048   ;;  %v559_v2 = vld [vmem:[%s2701_s15] sm:$0xff]  ;;  %v562_v3 = vld [vmem:[%s2701_s15 + $0x18] sm:$0xff]  ;;  %vm1586_vm2 = vcmask 130112   ;;  %vm1593_vm3 = vcmask 195712  }
  0x4c   : > { %v630_v4 = vsel %vm623_vm1, %v561_v1, 0.0  ;;  %v624_v5 = vsel %vm623_vm1, %v559_v2, 0.0  ;;  %v560_v6 = vld [vmem:[%s2701_s15 + $0x8] sm:$0xff]  ;;  %v633_v7 = vsel %vm623_vm1, %v562_v3, 0.0  ;;  %v563_v10 = vld [vmem:[%s2701_s15 + $0x20] sm:$0xff]  ;;  %v566_v13 = vld [vmem:[%s2701_s15 + $0x38] sm:$0xff] }
  0x4d   : > { %631 = vadd.xlane.f32.xlu1 %v630_v4  ;;  %625 = vadd.xlane.f32.xlu0 %v624_v5  ;;  %v627_v8 = vsel %vm623_vm1, %v560_v6, 0.0  ;;  %v564_v9 = vld [vmem:[%s2701_s15 + $0x28] sm:$0xff]  ;;  %v636_v12 = vsel %vm623_vm1, %v563_v10, 0.0  ;;  %v565_v14 = vld [vmem:[%s2701_s15 + $0x30] sm:$0xff]  ;;  %v645_v15 = vsel %vm623_vm1, %v566_v13, 0.0  ;;  %v567_v18 = vld [vmem:[%s2701_s15 + $0x40] sm:$0xff] }
  0x4e   : > { %v639_v11 = vsel %vm623_vm1, %v564_v9, 0.0  ;;  %v642_v16 = vsel %vm623_vm1, %v565_v14, 0.0  ;;  %v568_v17 = vld [vmem:[%s2701_s15 + $0x48] sm:$0xff]  ;;  %v648_v20 = vsel %vm623_vm1, %v567_v18, 0.0  ;;  %v570_v21 = vld [vmem:[%s2701_s15 + $0x58] sm:$0xff]  ;;  %v569_v22 = vld [vmem:[%s2701_s15 + $0x50] sm:$0xff] }
  0x4f   : > { %v651_v19 = vsel %vm623_vm1, %v568_v17, 0.0  ;;  %v657_v23 = vsel %vm623_vm1, %v570_v21, 0.0  ;;  %v654_v24 = vsel %vm623_vm1, %v569_v22, 0.0  ;;  %v572_v25 = vld [vmem:[%s2701_s15 + $0x68] sm:$0xff]  ;;  %v571_v26 = vld [vmem:[%s2701_s15 + $0x60] sm:$0xff]  ;;  %v574_v29 = vld [vmem:[%s2701_s15 + $0x78] sm:$0xff] }
  0x50   : > { %v663_v27 = vsel %vm623_vm1, %v572_v25, 0.0  ;;  %v660_v28 = vsel %vm623_vm1, %v571_v26, 0.0  ;;  %v573_v30 = vld [vmem:[%s2701_s15 + $0x70] sm:$0xff]  ;;  %v669_v31 = vsel %vm623_vm1, %v574_v29, 0.0  ;;  %v576_v33 = vld [vmem:[%s2701_s15 + $0x88] sm:$0xff]  ;;  %v575_v34 = vld [vmem:[%s2701_s15 + $0x80] sm:$0xff] }
  0x51   : > { %634 = vadd.xlane.f32.xlu1 %v633_v7  ;;  %628 = vadd.xlane.f32.xlu0 %v627_v8  ;;  %v666_v32 = vsel %vm623_vm1, %v573_v30, 0.0  ;;  %v675_v35 = vsel %vm623_vm1, %v576_v33, 0.0  ;;  %v672_v36 = vsel %vm623_vm1, %v575_v34, 0.0  ;;  %v578_v37 = vld [vmem:[%s2701_s15 + $0x98] sm:$0xff]  ;;  %v577_v38 = vld [vmem:[%s2701_s15 + $0x90] sm:$0xff]  ;;  %v580_v41 = vld [vmem:[%s2701_s15 + $0xa8] sm:$0xff] }
  0x52   : > { %v681_v39 = vsel %vm623_vm1, %v578_v37, 0.0  ;;  %v678_v40 = vsel %vm623_vm1, %v577_v38, 0.0  ;;  %v579_v42 = vld [vmem:[%s2701_s15 + $0xa0] sm:$0xff]  ;;  %v687_v43 = vsel %vm623_vm1, %v580_v41, 0.0  ;;  %v582_v45 = vld [vmem:[%s2701_s15 + $0xb8] sm:$0xff]  ;;  %v581_v46 = vld [vmem:[%s2701_s15 + $0xb0] sm:$0xff] }
  0x53   : > { %v684_v44 = vsel %vm623_vm1, %v579_v42, 0.0  ;;  %v693_v47 = vsel %vm623_vm1, %v582_v45, 0.0  ;;  %v690_v48 = vsel %vm623_vm1, %v581_v46, 0.0  ;;  %v584_v49 = vld [vmem:[%s2701_s15 + $0xc8] sm:$0xff]  ;;  %v583_v50 = vld [vmem:[%s2701_s15 + $0xc0] sm:$0xff]  ;;  %v586_v53 = vld [vmem:[%s2701_s15 + $0xd8] sm:$0xff] }
  0x54   : > { %v699_v51 = vsel %vm623_vm1, %v584_v49, 0.0  ;;  %v696_v52 = vsel %vm623_vm1, %v583_v50, 0.0  ;;  %v585_v54 = vld [vmem:[%s2701_s15 + $0xd0] sm:$0xff]  ;;  %v705_v55 = vsel %vm623_vm1, %v586_v53, 0.0  ;;  %v588_v57 = vld [vmem:[%s2701_s15 + $0xe8] sm:$0xff]  ;;  %v587_v58 = vld [vmem:[%s2701_s15 + $0xe0] sm:$0xff] }
  0x55   : > { %640 = vadd.xlane.f32.xlu1 %v639_v11  ;;  %637 = vadd.xlane.f32.xlu0 %v636_v12  ;;  %v702_v56 = vsel %vm623_vm1, %v585_v54, 0.0  ;;  %v711_v59 = vsel %vm623_vm1, %v588_v57, 0.0  ;;  %v708_v60 = vsel %vm623_vm1, %v587_v58, 0.0  ;;  %v590_v61 = vld [vmem:[%s2701_s15 + $0xf8] sm:$0xff]  ;;  %v589_v62 = vld [vmem:[%s2701_s15 + $0xf0] sm:$0xff]  ;;  %v592_v1 = vld [vmem:[%s2701_s15 + $0x108] sm:$0xff] }
  0x56   : > { %v717_v63 = vsel %vm623_vm1, %v590_v61, 0.0  ;;  %v714_v0 = vsel %vm623_vm1, %v589_v62, 0.0  ;;  %v591_v2 = vld [vmem:[%s2701_s15 + $0x100] sm:$0xff]  ;;  %v723_v3 = vsel %vm623_vm1, %v592_v1, 0.0  ;;  %v594_v5 = vld [vmem:[%s2701_s15 + $0x118] sm:$0xff]  ;;  %v593_v6 = vld [vmem:[%s2701_s15 + $0x110] sm:$0xff]  ;;  %v3444_v1 = vlaneseq }
  0x57   : > { %v720_v4 = vsel %vm623_vm1, %v591_v2, 0.0  ;;  %v729_v7 = vsel %vm623_vm1, %v594_v5, 0.0  ;;  %v726_v8 = vsel %vm623_vm1, %v593_v6, 0.0  ;;  %v596_v9 = vld [vmem:[%s2701_s15 + $0x128] sm:$0xff]  ;;  %v595_v10 = vld [vmem:[%s2701_s15 + $0x120] sm:$0xff]  ;;  %v598_v13 = vld [vmem:[%s2701_s15 + $0x138] sm:$0xff] }
  0x58   : > { %v735_v11 = vsel %vm623_vm1, %v596_v9, 0.0  ;;  %v732_v12 = vsel %vm623_vm1, %v595_v10, 0.0  ;;  %v597_v14 = vld [vmem:[%s2701_s15 + $0x130] sm:$0xff]  ;;  %v600_v17 = vld [vmem:[%s2701_s15 + $0x148] sm:$0xff]  ;;  %v599_v18 = vld [vmem:[%s2701_s15 + $0x140] sm:$0xff]  ;;  %v2833_v2 = vshrl.u32 %v3444_v1, 7 }
  0x59   : > { %646 = vadd.xlane.f32.xlu1 %v645_v15  ;;  %643 = vadd.xlane.f32.xlu0 %v642_v16  ;;  %v741_v15 = vsel %vm623_vm1, %v598_v13, 0.0  ;;  %v738_v16 = vsel %vm623_vm1, %v597_v14, 0.0  ;;  %v602_v21 = vld [vmem:[%s2701_s15 + $0x158] sm:$0xff]  ;;  %v601_v22 = vld [vmem:[%s2701_s15 + $0x150] sm:$0xff]  ;;  %v604_v25 = vld [vmem:[%s2701_s15 + $0x168] sm:$0xff]  ;;  %vm1600_vm4 = vcmask 261312  }
  0x5a   : > { %v603_v26 = vld [vmem:[%s2701_s15 + $0x160] sm:$0xff]  ;;  %v606_v29 = vld [vmem:[%s2701_s15 + $0x178] sm:$0xff]  ;;  %v605_v30 = vld [vmem:[%s2701_s15 + $0x170] sm:$0xff]  ;;  %3447 = vst [vmem:[#allocation7_spill] sm:$0xff] %v2833_v2  ;;  %vm1607_vm5 = vcmask 326912   ;;  %vm1614_vm6 = vcmask 392512  }
  0x5b   : > { %v608_v33 = vld [vmem:[%s2701_s15 + $0x188] sm:$0xff]  ;;  %v607_v34 = vld [vmem:[%s2701_s15 + $0x180] sm:$0xff]  ;;  %v610_v37 = vld [vmem:[%s2701_s15 + $0x198] sm:$0xff]  ;;  %vm1621_vm7 = vcmask 458112   ;;  %vm1628_vm8 = vcmask 523712   ;;  %vm1635_vm9 = vcmask 589312  }
  0x5c   : > { %v609_v38 = vld [vmem:[%s2701_s15 + $0x190] sm:$0xff]  ;;  %v612_v41 = vld [vmem:[%s2701_s15 + $0x1a8] sm:$0xff]  ;;  %v611_v42 = vld [vmem:[%s2701_s15 + $0x1a0] sm:$0xff]  ;;  %vm1642_vm10 = vcmask 654912   ;;  %vm1649_vm11 = vcmask 720512   ;;  %vm1656_vm12 = vcmask 786112  }
  0x5d   : > { %652 = vadd.xlane.f32.xlu1 %v651_v19  ;;  %649 = vadd.xlane.f32.xlu0 %v648_v20  ;;  %v747_v19 = vsel %vm623_vm1, %v600_v17, 0.0  ;;  %v744_v20 = vsel %vm623_vm1, %v599_v18, 0.0  ;;  %v614_v45 = vld [vmem:[%s2701_s15 + $0x1b8] sm:$0xff]  ;;  %v613_v46 = vld [vmem:[%s2701_s15 + $0x1b0] sm:$0xff]  ;;  %v616_v49 = vld [vmem:[%s2701_s15 + $0x1c8] sm:$0xff]  ;;  %vm1663_vm13 = vcmask 851712  }
  0x5e   : > { %v615_v50 = vld [vmem:[%s2701_s15 + $0x1c0] sm:$0xff]  ;;  %v618_v53 = vld [vmem:[%s2701_s15 + $0x1d8] sm:$0xff]  ;;  %v617_v54 = vld [vmem:[%s2701_s15 + $0x1d0] sm:$0xff]  ;;  %vm1670_vm14 = vcmask 917312   ;;  %vm1677_vm15 = vcmask 982912   ;;  %vm1684_vm0 = vcmask 1048512  }
  0x5f   : > { %v620_v57 = vld [vmem:[%s2701_s15 + $0x1e8] sm:$0xff]  ;;  %v619_v58 = vld [vmem:[%s2701_s15 + $0x1e0] sm:$0xff]  ;;  %v622_v61 = vld [vmem:[%s2701_s15 + $0x1f8] sm:$0xff]  ;;  %p2127_p12 = scmp.ne.s32.totalorder %s2472_s17, 6 }
  0x60   : > { %v621_v62 = vld [vmem:[%s2701_s15 + $0x1f0] sm:$0xff] }
  0x61   : > { %658 = vadd.xlane.f32.xlu1 %v657_v23  ;;  %655 = vadd.xlane.f32.xlu0 %v654_v24  ;;  %v753_v23 = vsel %vm623_vm1, %v602_v21, 0.0  ;;  %v750_v24 = vsel %vm623_vm1, %v601_v22, 0.0 }
  0x65   : > { %664 = vadd.xlane.f32.xlu1 %v663_v27  ;;  %661 = vadd.xlane.f32.xlu0 %v660_v28  ;;  %v759_v27 = vsel %vm623_vm1, %v604_v25, 0.0  ;;  %v756_v28 = vsel %vm623_vm1, %v603_v26, 0.0 }
  0x69   : > { %670 = vadd.xlane.f32.xlu1 %v669_v31  ;;  %667 = vadd.xlane.f32.xlu0 %v666_v32  ;;  %v765_v31 = vsel %vm623_vm1, %v606_v29, 0.0  ;;  %v762_v32 = vsel %vm623_vm1, %v605_v30, 0.0 }
  0x6d   : > { %676 = vadd.xlane.f32.xlu1 %v675_v35  ;;  %673 = vadd.xlane.f32.xlu0 %v672_v36  ;;  %v771_v35 = vsel %vm623_vm1, %v608_v33, 0.0  ;;  %v768_v36 = vsel %vm623_vm1, %v607_v34, 0.0 }
  0x71   : > { %682 = vadd.xlane.f32.xlu1 %v681_v39  ;;  %679 = vadd.xlane.f32.xlu0 %v678_v40  ;;  %v777_v39 = vsel %vm623_vm1, %v610_v37, 0.0  ;;  %v774_v40 = vsel %vm623_vm1, %v609_v38, 0.0 }
  0x75   : > { %688 = vadd.xlane.f32.xlu1 %v687_v43  ;;  %685 = vadd.xlane.f32.xlu0 %v684_v44  ;;  %v783_v43 = vsel %vm623_vm1, %v612_v41, 0.0  ;;  %v780_v44 = vsel %vm623_vm1, %v611_v42, 0.0 }
  0x79   : > { %694 = vadd.xlane.f32.xlu1 %v693_v47  ;;  %691 = vadd.xlane.f32.xlu0 %v690_v48  ;;  %v789_v47 = vsel %vm623_vm1, %v614_v45, 0.0  ;;  %v786_v48 = vsel %vm623_vm1, %v613_v46, 0.0 }
  0x7d   : > { %700 = vadd.xlane.f32.xlu1 %v699_v51  ;;  %697 = vadd.xlane.f32.xlu0 %v696_v52  ;;  %v795_v51 = vsel %vm623_vm1, %v616_v49, 0.0  ;;  %v792_v52 = vsel %vm623_vm1, %v615_v50, 0.0 }
  0x81   : > { %706 = vadd.xlane.f32.xlu1 %v705_v55  ;;  %703 = vadd.xlane.f32.xlu0 %v702_v56  ;;  %v801_v55 = vsel %vm623_vm1, %v618_v53, 0.0  ;;  %v798_v56 = vsel %vm623_vm1, %v617_v54, 0.0 }
  0x85   : > { %712 = vadd.xlane.f32.xlu1 %v711_v59  ;;  %709 = vadd.xlane.f32.xlu0 %v708_v60  ;;  %v807_v59 = vsel %vm623_vm1, %v620_v57, 0.0  ;;  %v804_v60 = vsel %vm623_vm1, %v619_v58, 0.0 }
  0x89   : > { %718 = vadd.xlane.f32.xlu1 %v717_v63  ;;  %715 = vadd.xlane.f32.xlu0 %v714_v0  ;;  %v813_v63 = vsel %vm623_vm1, %v622_v61, 0.0  ;;  %v810_v0 = vsel %vm623_vm1, %v621_v62, 0.0  ;;  %vm1923_vm1 = vcmask 1041409  }
  0x8d   : > { %724 = vadd.xlane.f32.xlu1 %v723_v3  ;;  %721 = vadd.xlane.f32.xlu0 %v720_v4  ;;  %v892_v3 = vsub.s32 0, %v2833_v2  ;;  %v2126_v4 = vld.sshfl [vmem:[%s2694_s13] sm:$0x33 pattern:$0x76325410] }
  0x8f   : > { %v2837_v5 = vrot.slane %v2126_v4, %v892_v3 }
  0x91   : > { %730 = vadd.xlane.f32.xlu1 %v729_v7  ;;  %727 = vadd.xlane.f32.xlu0 %v726_v8 }
  0x95   : > { %736 = vadd.xlane.f32.xlu1 %v735_v11  ;;  %733 = vadd.xlane.f32.xlu0 %v732_v12 }
  0x99   : > { %742 = vadd.xlane.f32.xlu1 %v741_v15  ;;  %739 = vadd.xlane.f32.xlu0 %v738_v16  ;;  %v889_v16 = vcombine.high %v2126_v4, %v2126_v4 }
  0x9d   : > { %748 = vadd.xlane.f32.xlu1 %v747_v19  ;;  %745 = vadd.xlane.f32.xlu0 %v744_v20  ;;  %v2874_v19 = vrot.slane %v889_v16, %v892_v3  ;;  %v1026_v20 = vsub.s32 1, %v2833_v2 }
  0x9f   : > { %v2897_v29 = vrot.slane %v2126_v4, %v1026_v20 }
  0xa1   : > { %754 = vadd.xlane.f32.xlu1 %v753_v23  ;;  %751 = vadd.xlane.f32.xlu0 %v750_v24  ;;  %v2883_v23 = vrot.slane %v889_v16, %v1026_v20 }
  0xa5   : > { %760 = vadd.xlane.f32.xlu1 %v759_v27  ;;  %757 = vadd.xlane.f32.xlu0 %v756_v28  ;;  %v2483_v28 = vmov 0  }
  0xa6   : > { %2250 = vset.pattern.permute.xlu0 %v2483_v28  ;;  %2256 = vset.pattern.permute.xlu1 %v2483_v28 }
  0xa9   : > { %766 = vadd.xlane.f32.xlu1 %v765_v31  ;;  %763 = vadd.xlane.f32.xlu0 %v762_v32 }
  0xad   : > { %772 = vadd.xlane.f32.xlu1 %v771_v35  ;;  %769 = vadd.xlane.f32.xlu0 %v768_v36 }
  0xb1   : > { %778 = vadd.xlane.f32.xlu1 %v777_v39  ;;  %775 = vadd.xlane.f32.xlu0 %v774_v40 }
  0xb5   : > { %784 = vadd.xlane.f32.xlu1 %v783_v43  ;;  %781 = vadd.xlane.f32.xlu0 %v780_v44 }
  0xb9   : > { %790 = vadd.xlane.f32.xlu1 %v789_v47  ;;  %787 = vadd.xlane.f32.xlu0 %v786_v48 }
  0xbd   : > { %796 = vadd.xlane.f32.xlu1 %v795_v51  ;;  %793 = vadd.xlane.f32.xlu0 %v792_v52 }
  0xc1   : > { %802 = vadd.xlane.f32.xlu1 %v801_v55  ;;  %799 = vadd.xlane.f32.xlu0 %v798_v56 }
  0xc5   : > { %808 = vadd.xlane.f32.xlu1 %v807_v59  ;;  %805 = vadd.xlane.f32.xlu0 %v804_v60 }
  0xc9   : > { %814 = vadd.xlane.f32.xlu1 %v813_v63  ;;  %811 = vadd.xlane.f32.xlu0 %v810_v0 }
  0xda   : > { %v2839_v6 = vpop.xlane.xlu1 %631  ;;  %v2841_v7 = vpop.xlane.xlu0 %625  ;;  %899 = vbcast.lane.b32.xlu1 %v2837_v5, 264 }
  0xde   : > { %v2844_v8 = vpop.xlane.xlu1 %634  ;;  %v2846_v9 = vpop.xlane.xlu0 %628  ;;  %903 = vbcast.lane.b32.xlu1 %v2837_v5, 272 }
  0xdf   : > { %895 = vbcast.lane.b32.xlu0 %v2837_v5, 256 }
  0xe2   : > { %v2850_v10 = vpop.xlane.xlu1 %640  ;;  %v2852_v11 = vpop.xlane.xlu0 %637  ;;  %907 = vbcast.lane.b32.xlu1 %v2837_v5, 280 }
  0xe3   : > { %911 = vbcast.lane.b32.xlu0 %v2837_v5, 288 }
  0xe6   : > { %v2856_v12 = vpop.xlane.xlu1 %646  ;;  %v2858_v13 = vpop.xlane.xlu0 %643  ;;  %915 = vbcast.lane.b32.xlu1 %v2837_v5, 296 }
  0xe7   : > { %919 = vbcast.lane.b32.xlu0 %v2837_v5, 304 }
  0xea   : > { %v2862_v14 = vpop.xlane.xlu1 %652  ;;  %v2864_v15 = vpop.xlane.xlu0 %649  ;;  %923 = vbcast.lane.b32.xlu1 %v2837_v5, 312 }
  0xeb   : > { %3448 = vst [vmem:[#allocation8_spill] sm:$0xff] %v2862_v14  ;;  %927 = vbcast.lane.b32.xlu0 %v2837_v5, 320 }
  0xee   : > { %v2868_v17 = vpop.xlane.xlu1 %658  ;;  %v2870_v18 = vpop.xlane.xlu0 %655  ;;  %931 = vbcast.lane.b32.xlu1 %v2837_v5, 328 }
  0xef   : > { %3449 = vst [vmem:[#allocation9_spill] sm:$0xff] %v2868_v17  ;;  %3450 = vst [vmem:[#allocation10_spill] sm:$0xff] %v2870_v18  ;;  %935 = vbcast.lane.b32.xlu0 %v2837_v5, 336 }
  0xf2   : > { %v2877_v21 = vpop.xlane.xlu1 %664  ;;  %v2879_v22 = vpop.xlane.xlu0 %661  ;;  %939 = vbcast.lane.b32.xlu1 %v2837_v5, 344 }
  0xf3   : > { %3451 = vst [vmem:[#allocation11_spill] sm:$0xff] %v2877_v21  ;;  %3452 = vst [vmem:[#allocation12_spill] sm:$0xff] %v2879_v22  ;;  %962 = vbcast.lane.b32.xlu0 %v2874_v19, 256 }
  0xf6   : > { %v2885_v24 = vpop.xlane.xlu1 %670  ;;  %v2887_v25 = vpop.xlane.xlu0 %667  ;;  %966 = vbcast.lane.b32.xlu1 %v2874_v19, 264 }
  0xf7   : > { %3453 = vst [vmem:[#allocation13_spill] sm:$0xff] %v2885_v24  ;;  %3454 = vst [vmem:[#allocation14_spill] sm:$0xff] %v2887_v25  ;;  %1096 = vbcast.lane.b32.xlu0 %v2883_v23, 256 }
  0xfa   : > { %v2891_v26 = vpop.xlane.xlu1 %676  ;;  %v2893_v27 = vpop.xlane.xlu0 %673  ;;  %1100 = vbcast.lane.b32.xlu1 %v2883_v23, 264 }
  0xfb   : > { %970 = vbcast.lane.b32.xlu0 %v2874_v19, 272 }
  0xfe   : > { %v2899_v30 = vpop.xlane.xlu1 %682  ;;  %v2901_v31 = vpop.xlane.xlu0 %679  ;;  %1029 = vbcast.lane.b32.xlu1 %v2897_v29, 256 }
  0xff   : > { %1033 = vbcast.lane.b32.xlu0 %v2897_v29, 264 }
 0x102   : > { %v2905_v32 = vpop.xlane.xlu1 %688  ;;  %v2907_v33 = vpop.xlane.xlu0 %685  ;;  %1104 = vbcast.lane.b32.xlu1 %v2883_v23, 272 }
 0x103   : > { %974 = vbcast.lane.b32.xlu0 %v2874_v19, 280 }
 0x106   : > { %v2911_v34 = vpop.xlane.xlu1 %694  ;;  %v2913_v35 = vpop.xlane.xlu0 %691  ;;  %1037 = vbcast.lane.b32.xlu1 %v2897_v29, 272 }
 0x107   : > { %1108 = vbcast.lane.b32.xlu0 %v2883_v23, 280 }
 0x10a   : > { %v2917_v36 = vpop.xlane.xlu1 %700  ;;  %v2919_v37 = vpop.xlane.xlu0 %697  ;;  %978 = vbcast.lane.b32.xlu1 %v2874_v19, 288 }
 0x10b   : > { %1041 = vbcast.lane.b32.xlu0 %v2897_v29, 280 }
 0x10e   : > { %v2923_v38 = vpop.xlane.xlu1 %706  ;;  %v2925_v39 = vpop.xlane.xlu0 %703  ;;  %1112 = vbcast.lane.b32.xlu1 %v2883_v23, 288 }
 0x10f   : > { %3455 = vst [vmem:[#allocation15_spill] sm:$0xff] %v2923_v38  ;;  %3456 = vst [vmem:[#allocation16_spill] sm:$0xff] %v2925_v39  ;;  %982 = vbcast.lane.b32.xlu0 %v2874_v19, 296 }
 0x112   : > { %v2929_v40 = vpop.xlane.xlu1 %712  ;;  %v2931_v41 = vpop.xlane.xlu0 %709  ;;  %1045 = vbcast.lane.b32.xlu1 %v2897_v29, 288 }
 0x113   : > { %3457 = vst [vmem:[#allocation17_spill] sm:$0xff] %v2929_v40  ;;  %3458 = vst [vmem:[#allocation18_spill] sm:$0xff] %v2931_v41  ;;  %1116 = vbcast.lane.b32.xlu0 %v2883_v23, 296 }
 0x116   : > { %v2935_v42 = vpop.xlane.xlu1 %718  ;;  %v2937_v43 = vpop.xlane.xlu0 %715  ;;  %986 = vbcast.lane.b32.xlu1 %v2874_v19, 304 }
 0x117   : > { %3459 = vst [vmem:[#allocation19_spill] sm:$0xff] %v2935_v42  ;;  %3460 = vst [vmem:[#allocation20_spill] sm:$0xff] %v2937_v43  ;;  %1049 = vbcast.lane.b32.xlu0 %v2897_v29, 296 }
 0x11a   : > { %v2941_v44 = vpop.xlane.xlu1 %724  ;;  %v2943_v45 = vpop.xlane.xlu0 %721  ;;  %1120 = vbcast.lane.b32.xlu1 %v2883_v23, 304 }
 0x11b   : > { %990 = vbcast.lane.b32.xlu0 %v2874_v19, 312 }
 0x11e   : > { %v2947_v46 = vpop.xlane.xlu1 %730  ;;  %v2949_v47 = vpop.xlane.xlu0 %727  ;;  %1053 = vbcast.lane.b32.xlu1 %v2897_v29, 304 }
 0x11f   : > { %1124 = vbcast.lane.b32.xlu0 %v2883_v23, 312 }
 0x122   : > { %v2953_v48 = vpop.xlane.xlu1 %736  ;;  %v2955_v49 = vpop.xlane.xlu0 %733  ;;  %994 = vbcast.lane.b32.xlu1 %v2874_v19, 320 }
 0x123   : > { %1057 = vbcast.lane.b32.xlu0 %v2897_v29, 312 }
 0x126   : > { %v2959_v50 = vpop.xlane.xlu1 %742  ;;  %v2961_v51 = vpop.xlane.xlu0 %739  ;;  %1128 = vbcast.lane.b32.xlu1 %v2883_v23, 320 }
 0x127   : > { %998 = vbcast.lane.b32.xlu0 %v2874_v19, 328 }
 0x12a   : > { %v2965_v52 = vpop.xlane.xlu1 %748  ;;  %v2967_v53 = vpop.xlane.xlu0 %745  ;;  %1061 = vbcast.lane.b32.xlu1 %v2897_v29, 320 }
 0x12b   : > { %3461 = vst [vmem:[#allocation21_spill] sm:$0xff] %v2965_v52  ;;  %3462 = vst [vmem:[#allocation22_spill] sm:$0xff] %v2967_v53  ;;  %1132 = vbcast.lane.b32.xlu0 %v2883_v23, 328 }
 0x12e   : > { %v2971_v54 = vpop.xlane.xlu1 %754  ;;  %v2973_v55 = vpop.xlane.xlu0 %751  ;;  %1002 = vbcast.lane.b32.xlu1 %v2874_v19, 336 }
 0x12f   : > { %3463 = vst [vmem:[#allocation23_spill] sm:$0xff] %v2971_v54  ;;  %3464 = vst [vmem:[#allocation24_spill] sm:$0xff] %v2973_v55  ;;  %1065 = vbcast.lane.b32.xlu0 %v2897_v29, 328  ;;  %v832_v54 = vmul.f32 0.0625, %v2893_v27  ;;  %v848_v27 = vmul.f32 0.0625, %v2943_v45 }
 0x132   : > { %v2977_v56 = vpop.xlane.xlu1 %760  ;;  %v2979_v57 = vpop.xlane.xlu0 %757  ;;  %1136 = vbcast.lane.b32.xlu1 %v2883_v23, 336 }
 0x133   : > { %3465 = vst [vmem:[#allocation25_spill] sm:$0xff] %v2977_v56  ;;  %3466 = vst [vmem:[#allocation26_spill] sm:$0xff] %v2979_v57  ;;  %1006 = vbcast.lane.b32.xlu0 %v2874_v19, 344 }
 0x136   : > { %v2983_v58 = vpop.xlane.xlu1 %766  ;;  %v2985_v59 = vpop.xlane.xlu0 %763  ;;  %1069 = vbcast.lane.b32.xlu1 %v2897_v29, 336 }
 0x137   : > { %3467 = vst [vmem:[#allocation27_spill] sm:$0xff] %v2983_v58  ;;  %3468 = vst [vmem:[#allocation28_spill] sm:$0xff] %v2985_v59  ;;  %1140 = vbcast.lane.b32.xlu0 %v2883_v23, 344 }
 0x13a   : > { %v773_v60 = vpop.xlane.xlu1 %772  ;;  %v770_v61 = vpop.xlane.xlu0 %769  ;;  %1010 = vbcast.lane.b32.xlu1 %v2874_v19, 352 }
 0x13b   : > { %1073 = vbcast.lane.b32.xlu0 %v2897_v29, 344  ;;  %v864_v52 = vmul.f32 0.0625, %v770_v61 }
 0x13e   : > { %v2991_v62 = vpop.xlane.xlu1 %778  ;;  %v2993_v63 = vpop.xlane.xlu0 %775  ;;  %1144 = vbcast.lane.b32.xlu1 %v2883_v23, 352 }
 0x13f   : > { %943 = vbcast.lane.b32.xlu0 %v2837_v5, 352 }
 0x142   : > { %v2997_v0 = vpop.xlane.xlu1 %784  ;;  %v2999_v3 = vpop.xlane.xlu0 %781  ;;  %1014 = vbcast.lane.b32.xlu1 %v2874_v19, 360 }
 0x143   : > { %1077 = vbcast.lane.b32.xlu0 %v2897_v29, 352 }
 0x146   : > { %v3003_v4 = vpop.xlane.xlu1 %790  ;;  %v3005_v16 = vpop.xlane.xlu0 %787  ;;  %1148 = vbcast.lane.b32.xlu1 %v2883_v23, 360 }
 0x147   : > { %947 = vbcast.lane.b32.xlu0 %v2837_v5, 360 }
 0x14a   : > { %v3009_v20 = vpop.xlane.xlu1 %796  ;;  %v3011_v28 = vpop.xlane.xlu0 %793  ;;  %1018 = vbcast.lane.b32.xlu1 %v2874_v19, 368 }
 0x14b   : > { %3469 = vst [vmem:[#allocation29_spill] sm:$0xff] %v3009_v20  ;;  %1081 = vbcast.lane.b32.xlu0 %v2897_v29, 360 }
 0x14e   : > { %v3015_v1 = vpop.xlane.xlu1 %802  ;;  %v3017_v2 = vpop.xlane.xlu0 %799  ;;  %1152 = vbcast.lane.b32.xlu1 %v2883_v23, 368 }
 0x14f   : > { %3470 = vst [vmem:[#allocation30_spill] sm:$0xff] %v3015_v1  ;;  %3471 = vst [vmem:[#allocation31_spill] sm:$0xff] %v3017_v2  ;;  %951 = vbcast.lane.b32.xlu0 %v2837_v5, 368  ;;  %v865_v2 = vmul.f32 0.0625, %v773_v60 }
 0x152   : > { %v3021_v58 = vpop.xlane.xlu1 %808  ;;  %v3023_v24 = vpop.xlane.xlu0 %805  ;;  %1022 = vbcast.lane.b32.xlu1 %v2874_v19, 376 }
 0x153   : > { %3472 = vst [vmem:[#allocation32_spill] sm:$0xff] %v3021_v58  ;;  %3473 = vst [vmem:[#allocation33_spill] sm:$0xff] %v3023_v24  ;;  %1085 = vbcast.lane.b32.xlu0 %v2897_v29, 368  ;;  %v833_v24 = vmul.f32 0.0625, %v2891_v26  ;;  %v834_v26 = vmul.f32 0.0625, %v2901_v31 }
 0x156   : > { %v3027_v59 = vpop.xlane.xlu1 %814  ;;  %v3029_v42 = vpop.xlane.xlu0 %811  ;;  %1156 = vbcast.lane.b32.xlu1 %v2883_v23, 376 }
 0x157   : > { %3474 = vst [vmem:[#allocation34_spill] sm:$0xff] %v3027_v59  ;;  %3475 = vst [vmem:[#allocation35_spill] sm:$0xff] %v3029_v42  ;;  %955 = vbcast.lane.b32.xlu0 %v2837_v5, 376 }
 0x15a   : > { %v900_v25 = vpop.permute.xlu1 %899  ;;  %v896_v56 = vpop.permute.xlu0 %895  ;;  %1089 = vbcast.lane.b32.xlu1 %v2897_v29, 376 }
 0x15e   : > { %v904_v43 = vpop.permute.xlu1 %903  ;;  %v3034_v21 = vpop.permute.xlu0 %911 }
 0x162   : > { %v3036_v58 = vpop.permute.xlu1 %907  ;;  %v3038_v19 = vpop.permute.xlu0 %919 }
 0x166   : > { %v3040_v57 = vpop.permute.xlu1 %915  ;;  %v3042_v59 = vpop.permute.xlu0 %927 }
 0x16a   : > { %v3044_v42 = vpop.permute.xlu1 %923  ;;  %v3046_v23 = vpop.permute.xlu0 %935 }
 0x16b   : > { %3476 = vst [vmem:[#allocation36_spill] sm:$0xff] %v3046_v23  ;;  %v816_v23 = vmul.f32 0.0625, %v2841_v7  ;;  %v818_v7 = vmul.f32 0.0625, %v2839_v6 }
 0x16d   : > { %v1222_v53 = vmul.f32 %v896_v56, %v816_v23 }
 0x16e   : > { %v3048_v5 = vpop.permute.xlu1 %931  ;;  %v963_v40 = vpop.permute.xlu0 %962 }
 0x16f   : > { %3477 = vst [vmem:[#allocation37_spill] sm:$0xff] %v3048_v5  ;;  %v1238_v1 = vmul.f32 %v963_v40, %v832_v54  ;;  %v817_v5 = vmul.f32 0.0625, %v2846_v9  ;;  %v849_v9 = vmul.f32 0.0625, %v2941_v44 }
 0x171   : > { %v1223_v20 = vmul.f32 %v900_v25, %v817_v5  ;;  %v837_v5 = vmul.f32 0.0625, %v2905_v32  ;;  %v852_v32 = vmul.f32 0.0625, %v2955_v49 }
 0x172   : > { %v3050_v22 = vpop.permute.xlu1 %939  ;;  %v1097_v29 = vpop.permute.xlu0 %1096 }
 0x173   : > { %3478 = vst [vmem:[#allocation38_spill] sm:$0xff] %v3050_v22  ;;  %v1270_v14 = vmul.f32 %v1097_v29, %v864_v52  ;;  %v1224_v52 = vmul.f32 %v904_v43, %v818_v7  ;;  %v836_v43 = vmul.f32 0.0625, %v2907_v33  ;;  %v820_v29 = vmul.f32 0.0625, %v2852_v11 }
 0x175   : > { %v1226_v33 = vmul.f32 %v3034_v21, %v820_v29 }
 0x176   : > { %v967_v41 = vpop.permute.xlu1 %966  ;;  %v971_v17 = vpop.permute.xlu0 %970 }
 0x177   : > { %v1239_v55 = vmul.f32 %v967_v41, %v833_v24  ;;  %v1240_v54 = vmul.f32 %v971_v17, %v834_v26  ;;  %v850_v17 = vmul.f32 0.0625, %v2949_v47  ;;  %v851_v26 = vmul.f32 0.0625, %v2947_v46 }
 0x179   : > { %v2251_v18 = vpack.i.bf16 %v1239_v55, %v1238_v1  ;;  %v835_v1 = vmul.f32 0.0625, %v2899_v30  ;;  %v867_v30 = vmul.f32 0.0625, %v2991_v62 }
 0x17a   : > { %v1101_v38 = vpop.permute.xlu1 %1100  ;;  %v1034_v39 = vpop.permute.xlu0 %1033 }
 0x17b   : > { %v1271_v22 = vmul.f32 %v1101_v38, %v865_v2  ;;  %2252 = vperm.xlu0 %2250, %v2251_v18   ;;  %v866_v2 = vmul.f32 0.0625, %v2993_v63  ;;  %v2262_v18 = vpack.i.bf16 %v1223_v20, %v1222_v53  ;;  %v819_v53 = vmul.f32 0.0625, %v2844_v8 }
 0x17d   : > { %v2257_v40 = vpack.i.bf16 %v1271_v22, %v1270_v14  ;;  %v1255_v14 = vmul.f32 %v1034_v39, %v849_v9  ;;  %v1225_v47 = vmul.f32 %v3036_v58, %v819_v53  ;;  %v869_v58 = vmul.f32 0.0625, %v2997_v0 }
 0x17e   : > { %v1030_v24 = vpop.permute.xlu1 %1029  ;;  %v975_v41 = vpop.permute.xlu0 %974  ;;  %v840_v53 = vmul.f32 0.0625, %v2919_v37 }
 0x17f   : > { %v1254_v55 = vmul.f32 %v1030_v24, %v848_v27  ;;  %2258 = vperm.xlu1 %2256, %v2257_v40   ;;  %v1241_v38 = vmul.f32 %v975_v41, %v835_v1  ;;  %v868_v27 = vmul.f32 0.0625, %v2999_v3  ;;  %v821_v3 = vmul.f32 0.0625, %v2850_v10 }
 0x181   : > { %v2267_v31 = vpack.i.bf16 %v1254_v55, %v1240_v54  ;;  %v2277_v56 = vpack.i.bf16 %v1241_v38, %v1224_v52  ;;  %v1227_v49 = vmul.f32 %v3040_v57, %v821_v3  ;;  %v853_v52 = vmul.f32 0.0625, %v2953_v48 }
 0x182   : > { %v1105_v45 = vpop.permute.xlu1 %1104  ;;  %v1109_v25 = vpop.permute.xlu0 %1108  ;;  %v871_v57 = vmul.f32 0.0625, %v3003_v4 }
 0x183   : > { %v1272_v22 = vmul.f32 %v1105_v45, %v866_v2  ;;  %2263 = vperm.xlu1 %2256, %v2262_v18   ;;  %2268 = vperm.xlu0 %2250, %v2267_v31   ;;  %v1273_v61 = vmul.f32 %v1109_v25, %v867_v30  ;;  %v838_v18 = vmul.f32 0.0625, %v2913_v35  ;;  %v839_v45 = vmul.f32 0.0625, %v2911_v34 }
 0x184   : > { %v822_v25 = vmul.f32 0.0625, %v2858_v13  ;;  %v854_v34 = vmul.f32 0.0625, %v2961_v51 }
 0x185   : > { %v2272_v6 = vpack.i.bf16 %v1272_v22, %v1255_v14  ;;  %v870_v14 = vmul.f32 0.0625, %v3005_v16  ;;  %v823_v16 = vmul.f32 0.0625, %v2856_v12 }
 0x186   : > { %v1038_v60 = vpop.permute.xlu1 %1037  ;;  %v1042_v44 = vpop.permute.xlu0 %1041  ;;  %v1228_v35 = vmul.f32 %v3038_v19, %v822_v25 }
 0x187   : > { %v1256_v63 = vmul.f32 %v1038_v60, %v850_v17  ;;  %2273 = vperm.xlu1 %2256, %v2272_v6   ;;  %2278 = vperm.xlu0 %2250, %v2277_v56   ;;  %v1257_v1 = vmul.f32 %v1042_v44, %v851_v26  ;;  %v1229_v51 = vmul.f32 %v3044_v42, %v823_v16  ;;  %v3480_v42 = vld [vmem:[#allocation29_spill] sm:$0xff] }
 0x188   : > { %v3491_v16 = vld [vmem:[#allocation9_spill] sm:$0xff] }
 0x189   : > { %v2282_v39 = vpack.i.bf16 %v1273_v61, %v1256_v63 }
 0x18a   : > { %v979_v20 = vpop.permute.xlu1 %978  ;;  %v983_v23 = vpop.permute.xlu0 %982 }
 0x18b   : > { %v1242_v62 = vmul.f32 %v979_v20, %v836_v43  ;;  %2283 = vperm.xlu1 %2256, %v2282_v39   ;;  %v1243_v24 = vmul.f32 %v983_v23, %v837_v5  ;;  %v841_v20 = vmul.f32 0.0625, %v2917_v36  ;;  %v824_v23 = vmul.f32 0.0625, %v2864_v15  ;;  %v3479_v36 = vld [vmem:[#allocation22_spill] sm:$0xff] }
 0x18c   : > { %v855_v5 = vmul.f32 0.0625, %v2959_v50 }
 0x18d   : > { %v2287_v40 = vpack.i.bf16 %v1242_v62, %v1225_v47  ;;  %v2297_v55 = vpack.i.bf16 %v1243_v24, %v1226_v33  ;;  %v872_v47 = vmul.f32 0.0625, %v3011_v28  ;;  %v1230_v37 = vmul.f32 %v3042_v59, %v824_v23  ;;  %v3481_v28 = vld [vmem:[#allocation8_spill] sm:$0xff] }
 0x18e   : > { %v1113_v8 = vpop.permute.xlu1 %1112  ;;  %v1117_v41 = vpop.permute.xlu0 %1116  ;;  %v856_v24 = vmul.f32 0.0625, %v3479_v36 }
 0x18f   : > { %v1274_v54 = vmul.f32 %v1113_v8, %v868_v27  ;;  %2288 = vperm.xlu0 %2250, %v2287_v40   ;;  %v1275_v46 = vmul.f32 %v1117_v41, %v869_v58  ;;  %v873_v8 = vmul.f32 0.0625, %v3480_v42  ;;  %v3482_v58 = vld [vmem:[#allocation16_spill] sm:$0xff] }
 0x191   : > { %v2292_v7 = vpack.i.bf16 %v1274_v54, %v1257_v1 }
 0x192   : > { %v1046_v11 = vpop.permute.xlu1 %1045  ;;  %v1050_v9 = vpop.permute.xlu0 %1049 }
 0x193   : > { %v1258_v2 = vmul.f32 %v1046_v11, %v852_v32  ;;  %2293 = vperm.xlu1 %2256, %v2292_v7   ;;  %2298 = vperm.xlu0 %2250, %v2297_v55   ;;  %v1259_v56 = vmul.f32 %v1050_v9, %v853_v52  ;;  %v825_v32 = vmul.f32 0.0625, %v3481_v28  ;;  %v842_v55 = vmul.f32 0.0625, %v3482_v58  ;;  %v3483_v9 = vld [vmem:[#allocation15_spill] sm:$0xff] }
 0x194   : > { %v1303_v28 = vld [vmem:[%s2699_s25 + $0x80] sm:$0xff] }
 0x195   : > { %v2302_v21 = vpack.i.bf16 %v1275_v46, %v1258_v2  ;;  %v843_v46 = vmul.f32 0.0625, %v3483_v9  ;;  %v3484_v2 = vld [vmem:[#allocation37_spill] sm:$0xff]  ;;  %v3499_v9 = vld [vmem:[#allocation32_spill] sm:$0xff] }
 0x196   : > { %v987_v31 = vpop.permute.xlu1 %986  ;;  %v991_v38 = vpop.permute.xlu0 %990  ;;  %v1231_v3 = vmul.f32 %v3484_v2, %v825_v32  ;;  %v1304_v32 = vld [vmem:[%s2699_s25 + $0x88] sm:$0xff] }
 0x197   : > { %v1244_v0 = vmul.f32 %v987_v31, %v838_v18  ;;  %2303 = vperm.xlu1 %2256, %v2302_v21   ;;  %v1245_v17 = vmul.f32 %v991_v38, %v839_v45  ;;  %v3485_v21 = vld [vmem:[#allocation10_spill] sm:$0xff]  ;;  %v3486_v38 = vld [vmem:[#allocation21_spill] sm:$0xff]  ;;  %v2169_v58 = vpack.c.bf16 %v1304_v32, %v1303_v28  ;;  %v3506_v28 = vld [vmem:[#allocation28_spill] sm:$0xff] }
 0x198   : > { %v826_v31 = vmul.f32 0.0625, %v3485_v21  ;;  %v857_v45 = vmul.f32 0.0625, %v3486_v38  ;;  %v862_v32 = vmul.f32 0.0625, %v3506_v28 }
 0x199   : > { %v2307_v22 = vpack.i.bf16 %v1244_v0, %v1227_v49  ;;  %v2317_v60 = vpack.i.bf16 %v1245_v17, %v1228_v35  ;;  %v3487_v49 = vld [vmem:[#allocation31_spill] sm:$0xff]  ;;  %v3488_v17 = vld [vmem:[#allocation36_spill] sm:$0xff]  ;;  %2170 = vmatprep.subr.bf16.mxu0 %v2169_v58  ;;  %v3507_v58 = vld [vmem:[#allocation34_spill] sm:$0xff] }
 0x19a   : > { %v1121_v10 = vpop.permute.xlu1 %1120  ;;  %v1125_v30 = vpop.permute.xlu0 %1124  ;;  %v874_v0 = vmul.f32 0.0625, %v3487_v49  ;;  %v1306_v49 = vld [vmem:[%s2699_s25 + $0x98] sm:$0xff] }
 0x19b   : > { %v1276_v6 = vmul.f32 %v1121_v10, %v870_v14  ;;  %2308 = vperm.xlu0 %2250, %v2307_v22   ;;  %v1277_v48 = vmul.f32 %v1125_v30, %v871_v57  ;;  %v1232_v10 = vmul.f32 %v3488_v17, %v826_v31  ;;  %v3501_v17 = vld [vmem:[#allocation20_spill] sm:$0xff] }
 0x19d   : > { %v2312_v44 = vpack.i.bf16 %v1276_v6, %v1259_v56  ;;  %v3489_v56 = vld [vmem:[#allocation24_spill] sm:$0xff] }
 0x19e   : > { %v1054_v13 = vpop.permute.xlu1 %1053  ;;  %v1058_v61 = vpop.permute.xlu0 %1057  ;;  %v858_v6 = vmul.f32 0.0625, %v3489_v56 }
 0x19f   : > { %v1260_v63 = vmul.f32 %v1054_v13, %v854_v34  ;;  %2313 = vperm.xlu1 %2256, %v2312_v44   ;;  %2318 = vperm.xlu0 %2250, %v2317_v60   ;;  %v1261_v27 = vmul.f32 %v1058_v61, %v855_v5  ;;  %v3490_v34 = vld [vmem:[#allocation30_spill] sm:$0xff] }
 0x1a0   : > { %v875_v57 = vmul.f32 0.0625, %v3490_v34 }
 0x1a1   : > { %v2322_v19 = vpack.i.bf16 %v1277_v48, %v1260_v63 }
 0x1a2   : > { %v995_v43 = vpop.permute.xlu1 %994  ;;  %v999_v39 = vpop.permute.xlu0 %998 }
 0x1a3   : > { %v1246_v4 = vmul.f32 %v995_v43, %v840_v53  ;;  %2323 = vperm.xlu1 %2256, %v2322_v19   ;;  %v1247_v29 = vmul.f32 %v999_v39, %v841_v20  ;;  %v827_v53 = vmul.f32 0.0625, %v3491_v16  ;;  %v3492_v19 = vld [vmem:[#allocation18_spill] sm:$0xff] }
 0x1a4   : > { %v844_v43 = vmul.f32 0.0625, %v3492_v19 }
 0x1a5   : > { %v2327_v62 = vpack.i.bf16 %v1246_v4, %v1229_v51  ;;  %v2337_v41 = vpack.i.bf16 %v1247_v29, %v1230_v37  ;;  %v3493_v4 = vld [vmem:[#allocation38_spill] sm:$0xff]  ;;  %v3495_v29 = vld [vmem:[#allocation33_spill] sm:$0xff] }
 0x1a6   : > { %v1129_v12 = vpop.permute.xlu1 %1128  ;;  %v1133_v26 = vpop.permute.xlu0 %1132  ;;  %v1233_v23 = vmul.f32 %v3493_v4, %v827_v53  ;;  %v3503_v53 = vld [vmem:[#allocation35_spill] sm:$0xff] }
 0x1a7   : > { %v1278_v40 = vmul.f32 %v1129_v12, %v872_v47  ;;  %2328 = vperm.xlu0 %2250, %v2327_v62   ;;  %v1279_v50 = vmul.f32 %v1133_v26, %v873_v8  ;;  %v3494_v47 = vld [vmem:[#allocation23_spill] sm:$0xff]  ;;  %v876_v12 = vmul.f32 0.0625, %v3495_v29  ;;  %v3497_v8 = vld [vmem:[#allocation17_spill] sm:$0xff]  ;;  %v878_v19 = vmul.f32 0.0625, %v3503_v53 }
 0x1a8   : > { %v859_v62 = vmul.f32 0.0625, %v3494_v47  ;;  %v1294_v29 = vld [vmem:[%s2699_s25 + $0x38] sm:$0xff] }
 0x1a9   : > { %v2332_v33 = vpack.i.bf16 %v1278_v40, %v1261_v27 }
 0x1aa   : > { %v1062_v15 = vpop.permute.xlu1 %1061  ;;  %v1066_v1 = vpop.permute.xlu0 %1065 }
 0x1ab   : > { %v1262_v54 = vmul.f32 %v1062_v15, %v856_v24  ;;  %2333 = vperm.xlu1 %2256, %v2332_v33   ;;  %2338 = vperm.xlu0 %2250, %v2337_v41   ;;  %v1263_v30 = vmul.f32 %v1066_v1, %v857_v45  ;;  %v3496_v24 = vld [vmem:[#allocation12_spill] sm:$0xff]  ;;  %v845_v41 = vmul.f32 0.0625, %v3497_v8 }
 0x1ac   : > { %v828_v42 = vmul.f32 0.0625, %v3496_v24  ;;  %v1305_v45 = vld [vmem:[%s2699_s25 + $0x90] sm:$0xff] }
 0x1ad   : > { %v2342_v59 = vpack.i.bf16 %v1279_v50, %v1262_v54 }
 0x1ae   : > { %v1003_v7 = vpop.permute.xlu1 %1002  ;;  %v1007_v11 = vpop.permute.xlu0 %1006 }
 0x1af   : > { %v1248_v18 = vmul.f32 %v1003_v7, %v842_v55  ;;  %2343 = vperm.xlu1 %2256, %v2342_v59   ;;  %v1249_v52 = vmul.f32 %v1007_v11, %v843_v46  ;;  %v1287_v55 = vld [vmem:[%s2699_s25] sm:$0xff]  ;;  %v1288_v59 = vld [vmem:[%s2699_s25 + $0x8] sm:$0xff]  ;;  %v877_v46 = vmul.f32 0.0625, %v3499_v9 }
 0x1b0   : > { %v3498_v7 = vld [vmem:[#allocation26_spill] sm:$0xff] }
 0x1b1   : > { %v2347_v25 = vpack.i.bf16 %v1248_v18, %v1231_v3  ;;  %v2357_v60 = vpack.i.bf16 %v1249_v52, %v1232_v10  ;;  %v860_v11 = vmul.f32 0.0625, %v3498_v7  ;;  %v2171_v3 = vpack.c.bf16 %v1288_v59, %v1287_v55  ;;  %v1290_v52 = vld [vmem:[%s2699_s25 + $0x18] sm:$0xff] }
 0x1b2   : > { %v1137_v14 = vpop.permute.xlu1 %1136  ;;  %v1141_v22 = vpop.permute.xlu0 %1140  ;;  %v846_v10 = vmul.f32 0.0625, %v3501_v17  ;;  %v879_v55 = vmul.f32 0.0625, %v3507_v58 }
 0x1b3   : > { %v1280_v35 = vmul.f32 %v1137_v14, %v874_v0  ;;  %2348 = vperm.xlu0 %2250, %v2347_v25   ;;  %v1281_v48 = vmul.f32 %v1141_v22, %v875_v57  ;;  %2172 = vmatpush3.bf16.msra.mxu0 %v2171_v3  ;;  %v2173_v0 = vpack.c.bf16 %v1306_v49, %v1305_v45  ;;  %v1289_v25 = vld [vmem:[%s2699_s25 + $0x10] sm:$0xff]  ;;  %v3500_v14 = vld [vmem:[#allocation11_spill] sm:$0xff]  ;;  %v1314_v3 = vld [vmem:[%s2699_s25 + $0xd8] sm:$0xff] }
 0x1b4   : > { %v829_v22 = vmul.f32 0.0625, %v3500_v14  ;;  %v1307_v57 = vld [vmem:[%s2699_s25 + $0xa0] sm:$0xff]  ;;  %v3508_v45 = vld [vmem:[#allocation13_spill] sm:$0xff] }
 0x1b5   : > { %v2352_v44 = vpack.i.bf16 %v1280_v35, %v1263_v30  ;;  %v2175_v35 = vpack.c.bf16 %v1290_v52, %v1289_v25  ;;  %2174 = vmatprep.subr.bf16.mxu0 %v2173_v0  ;;  %v831_v49 = vmul.f32 0.0625, %v3508_v45  ;;  %v3509_v0 = vld [vmem:[#allocation27_spill] sm:$0xff] }
 0x1b6   : > { %v1070_v13 = vpop.permute.xlu1 %1069  ;;  %v1074_v61 = vpop.permute.xlu0 %1073  ;;  %v863_v25 = vmul.f32 0.0625, %v3509_v0 }
 0x1b7   : > { %v1264_v63 = vmul.f32 %v1070_v13, %v858_v6  ;;  %2353 = vperm.xlu1 %2256, %v2352_v44   ;;  %2358 = vperm.xlu0 %2250, %v2357_v60   ;;  %v1265_v40 = vmul.f32 %v1074_v61, %v859_v62  ;;  %v1308_v60 = vld [vmem:[%s2699_s25 + $0xa8] sm:$0xff]  ;;  %v1291_v61 = vld [vmem:[%s2699_s25 + $0x20] sm:$0xff]  ;;  %v1293_v62 = vld [vmem:[%s2699_s25 + $0x30] sm:$0xff] }
 0x1b8   : > { %2176 = vmatpush3.bf16.msra.mxu0 %v2175_v35  ;;  %v2177_v13 = vpack.c.bf16 %v1308_v60, %v1307_v57  ;;  %v1316_v35 = vld [vmem:[%s2699_s25 + $0xe8] sm:$0xff] }
 0x1b9   : > { %v2362_v39 = vpack.i.bf16 %v1281_v48, %v1264_v63  ;;  %v1292_v48 = vld [vmem:[%s2699_s25 + $0x28] sm:$0xff]  ;;  %v3502_v63 = vld [vmem:[#allocation25_spill] sm:$0xff] }
 0x1ba   : > { %v1011_v20 = vpop.permute.xlu1 %1010  ;;  %v944_v51 = vpop.permute.xlu0 %943  ;;  %v861_v16 = vmul.f32 0.0625, %v3502_v63  ;;  %2178 = vmatprep.subr.bf16.mxu0 %v2177_v13  ;;  %v1318_v13 = vld [vmem:[%s2699_s25 + $0xf8] sm:$0xff] }
 0x1bb   : > { %v1250_v5 = vmul.f32 %v1011_v20, %v844_v43  ;;  %2363 = vperm.xlu1 %2256, %v2362_v39   ;;  %v1234_v50 = vmul.f32 %v944_v51, %v828_v42  ;;  %v2179_v39 = vpack.c.bf16 %v1292_v48, %v1291_v61  ;;  %v1301_v48 = vld [vmem:[%s2699_s25 + $0x70] sm:$0xff]  ;;  %v1302_v63 = vld [vmem:[%s2699_s25 + $0x78] sm:$0xff] }
 0x1bd   : > { %v2367_v26 = vpack.i.bf16 %v1250_v5, %v1233_v23  ;;  %2180 = vmatpush3.bf16.msra.mxu0 %v2179_v39  ;;  %v1309_v23 = vld [vmem:[%s2699_s25 + $0xb0] sm:$0xff]  ;;  %v1310_v5 = vld [vmem:[%s2699_s25 + $0xb8] sm:$0xff] }
 0x1be   : > { %v1145_v37 = vpop.permute.xlu1 %1144  ;;  %v1078_v27 = vpop.permute.xlu0 %1077  ;;  %v2181_v47 = vpack.c.bf16 %v1310_v5, %v1309_v23 }
 0x1bf   : > { %v1282_v36 = vmul.f32 %v1145_v37, %v876_v12  ;;  %2368 = vperm.xlu0 %2250, %v2367_v26   ;;  %v1266_v31 = vmul.f32 %v1078_v27, %v860_v11  ;;  %v3504_v12 = vld [vmem:[#allocation14_spill] sm:$0xff]  ;;  %v3505_v37 = vld [vmem:[#allocation19_spill] sm:$0xff] }
 0x1c0   : > { %v830_v26 = vmul.f32 0.0625, %v3504_v12  ;;  %v847_v27 = vmul.f32 0.0625, %v3505_v37  ;;  %2182 = vmatprep.subr.bf16.mxu0 %v2181_v47  ;;  %v3510_v47 = vlaneseq }
 0x1c1   : > { %v2372_v33 = vpack.i.bf16 %v1282_v36, %v1265_v40  ;;  %v2183_v36 = vpack.c.bf16 %v1294_v29, %v1293_v62 }
 0x1c2   : > { %v1015_v15 = vpop.permute.xlu1 %1014  ;;  %v948_v1 = vpop.permute.xlu0 %947  ;;  %v1576_v62 = vand.u32 127, %v3510_v47 }
 0x1c3   : > { %v1251_v54 = vmul.f32 %v1015_v15, %v845_v41  ;;  %2373 = vperm.xlu1 %2256, %v2372_v33   ;;  %v1235_v6 = vmul.f32 %v948_v1, %v829_v22  ;;  %2184 = vmatpush3.bf16.msra.mxu0 %v2183_v36  ;;  %v1311_v33 = vld [vmem:[%s2699_s25 + $0xc0] sm:$0xff]  ;;  %v1312_v15 = vld [vmem:[%s2699_s25 + $0xc8] sm:$0xff] }
 0x1c4   : > { %v2185_v1 = vpack.c.bf16 %v1312_v15, %v1311_v33  ;;  %v1588_v37 = vadd.s32 4294967280, %v1576_v62  ;;  %v1609_v36 = vadd.s32 4294967256, %v1576_v62  ;;  %v1630_v33 = vadd.s32 4294967232, %v1576_v62 }
 0x1c5   : > { %v2377_v2 = vpack.i.bf16 %v1251_v54, %v1234_v50  ;;  %v1295_v50 = vld [vmem:[%s2699_s25 + $0x40] sm:$0xff]  ;;  %v1296_v54 = vld [vmem:[%s2699_s25 + $0x48] sm:$0xff]  ;;  %v1637_v15 = vadd.s32 4294967224, %v1576_v62  ;;  %v1644_v28 = vadd.s32 4294967216, %v1576_v62 }
 0x1c6   : > { %v1149_v18 = vpop.permute.xlu1 %1148  ;;  %v1082_v21 = vpop.permute.xlu0 %1081  ;;  %v2187_v7 = vpack.c.bf16 %v1296_v54, %v1295_v50  ;;  %2186 = vmatprep.subr.bf16.mxu0 %v2185_v1  ;;  %v3511_v1 = vld [vmem:[#allocation7_spill] sm:$0xff] }
 0x1c7   : > { %v1283_v38 = vmul.f32 %v1149_v18, %v877_v46  ;;  %2378 = vperm.xlu0 %2250, %v2377_v2   ;;  %v1267_v51 = vmul.f32 %v1082_v21, %v861_v16  ;;  %v1313_v2 = vld [vmem:[%s2699_s25 + $0xd0] sm:$0xff]  ;;  %v2199_v16 = vpack.c.bf16 %v1302_v63, %v1301_v48  ;;  %v1579_v50 = vsub.s32 %v1576_v62, %v3511_v1 }
 0x1c8   : > { %2188 = vmatpush3.bf16.msra.mxu0 %v2187_v7  ;;  %v2189_v21 = vpack.c.bf16 %v1314_v3, %v1313_v2  ;;  %v1591_v58 = vsub.s32 %v1588_v37, %v3511_v1  ;;  %v1665_v7 = vadd.s32 4294967192, %v1576_v62  ;;  %v3205_v0 = vsub.s32 %v1644_v28, %v3511_v1 }
 0x1c9   : > { %v2382_v30 = vpack.i.bf16 %v1283_v38, %v1266_v31  ;;  %v1297_v31 = vld [vmem:[%s2699_s25 + $0x50] sm:$0xff]  ;;  %v1298_v38 = vld [vmem:[%s2699_s25 + $0x58] sm:$0xff] }
 0x1ca   : > { %v1019_v56 = vpop.permute.xlu1 %1018  ;;  %v952_v44 = vpop.permute.xlu0 %951  ;;  %v2191_v14 = vpack.c.bf16 %v1298_v38, %v1297_v31  ;;  %2190 = vmatprep.subr.bf16.mxu0 %v2189_v21  ;;  %v3197_v21 = vsub.s32 %v1630_v33, %v3511_v1  ;;  %v3200_v31 = vsub.s32 %v1637_v15, %v3511_v1 }
 0x1cb   : > { %v1252_v34 = vmul.f32 %v1019_v56, %v846_v10  ;;  %2383 = vperm.xlu1 %2256, %v2382_v30   ;;  %v1236_v8 = vmul.f32 %v952_v44, %v830_v26  ;;  %v1315_v30 = vld [vmem:[%s2699_s25 + $0xe0] sm:$0xff]  ;;  %v1317_v44 = vld [vmem:[%s2699_s25 + $0xf0] sm:$0xff]  ;;  %v1581_v26 = vadd.s32 4294967288, %v1576_v62 }
 0x1cc   : > { %2192 = vmatpush3.bf16.msra.mxu0 %v2191_v14  ;;  %v2193_v56 = vpack.c.bf16 %v1316_v35, %v1315_v30  ;;  %v2197_v61 = vpack.c.bf16 %v1318_v13, %v1317_v44 }
 0x1cd   : > { %v2387_v43 = vpack.i.bf16 %v1252_v34, %v1235_v6  ;;  %v1299_v6 = vld [vmem:[%s2699_s25 + $0x60] sm:$0xff]  ;;  %v1300_v34 = vld [vmem:[%s2699_s25 + $0x68] sm:$0xff]  ;;  %v1584_v54 = vsub.s32 %v1581_v26, %v3511_v1 }
 0x1ce   : > { %v1153_v20 = vpop.permute.xlu1 %1152  ;;  %v1086_v24 = vpop.permute.xlu0 %1085  ;;  %v2195_v60 = vpack.c.bf16 %v1300_v34, %v1299_v6  ;;  %2194 = vmatprep.subr.bf16.mxu0 %v2193_v56  ;;  %v1672_v56 = vadd.s32 4294967184, %v1576_v62  ;;  %v1679_v6 = vadd.s32 4294967176, %v1576_v62 }
 0x1cf   : > { %v1284_v4 = vmul.f32 %v1153_v20, %v878_v19  ;;  %2388 = vperm.xlu0 %2250, %v2387_v43   ;;  %v1268_v9 = vmul.f32 %v1086_v24, %v862_v32  ;;  %v1616_v24 = vadd.s32 4294967248, %v1576_v62  ;;  %v1651_v32 = vadd.s32 4294967208, %v1576_v62 }
 0x1d0   : > { %2196 = vmatpush3.bf16.msra.mxu0 %v2195_v60  ;;  %v3233_v37 = vsub.s32 %v1672_v56, %v3511_v1 }
 0x1d1   : > { %v2392_v40 = vpack.i.bf16 %v1284_v4, %v1267_v51  ;;  %2198 = vmatprep.subr.bf16.mxu0 %v2197_v61 }
 0x1d2   : > { %v1023_v42 = vpop.permute.xlu1 %1022  ;;  %v956_v18 = vpop.permute.xlu0 %955 }
 0x1d3   : > { %v1253_v41 = vmul.f32 %v1023_v42, %v847_v27  ;;  %2393 = vperm.xlu1 %2256, %v2392_v40   ;;  %v1237_v17 = vmul.f32 %v956_v18, %v831_v49  ;;  %v1595_v27 = vadd.s32 4294967272, %v1576_v62  ;;  %v1602_v40 = vadd.s32 4294967264, %v1576_v62 }
 0x1d4   : > { %2200 = vmatpush3.bf16.msra.mxu0 %v2199_v16 }
 0x1d5   : > { %v2397_v59 = vpack.i.bf16 %v1253_v41, %v1236_v8  ;;  %v1623_v8 = vadd.s32 4294967240, %v1576_v62 }
 0x1d6   : > { %v1157_v11 = vpop.permute.xlu1 %1156 }
 0x1d7   : > { %v1285_v46 = vmul.f32 %v1157_v11, %v879_v55  ;;  %2398 = vperm.xlu0 %2250, %v2397_v59   ;;  %v3182_v55 = vsub.s32 %v1595_v27, %v3511_v1  ;;  %v1658_v59 = vadd.s32 4294967200, %v1576_v62  ;;  %v3185_v11 = vsub.s32 %v1602_v40, %v3511_v1 }
 0x1d8   : > { %v3194_v2 = vsub.s32 %v1623_v8, %v3511_v1 }
 0x1d9   : > { %v2402_v52 = vpack.i.bf16 %v1285_v46, %v1268_v9  ;;  %v3188_v9 = vsub.s32 %v1609_v36, %v3511_v1  ;;  %v3191_v46 = vsub.s32 %v1616_v24, %v3511_v1 }
 0x1da   : > { %v1090_v22 = vpop.permute.xlu1 %1089 }
 0x1db   : > { %v1269_v10 = vmul.f32 %v1090_v22, %v863_v25  ;;  %2403 = vperm.xlu1 %2256, %v2402_v52   ;;  %v3208_v25 = vsub.s32 %v1651_v32, %v3511_v1 }
 0x1dd   : > { %v2407_v57 = vpack.i.bf16 %v1269_v10, %v1237_v17  ;;  %v3215_v17 = vsub.s32 %v1658_v59, %v3511_v1  ;;  %v3218_v10 = vsub.s32 %v1665_v7, %v3511_v1 }
 0x1df   : > { %2408 = vperm.xlu0 %2250, %v2407_v57  }
 0x1fa   : > { %v2253_v43 = vpop.permute.xlu0 %2252 }
 0x1fb   : > { %v2255_v3 = vunpack.i.h.bf16 %v2253_v43  ;;  %v2254_v18 = vunpack.i.l.bf16 %v2253_v43 }
 0x1fd   : > { %v1693_v34 = vrot.slane %v2255_v3, %v1584_v54  ;;  %v1689_v57 = vrot.slane %v2254_v18, %v1579_v50 }
 0x1fe   : > { %v2259_v53 = vpop.permute.xlu1 %2258 }
 0x1ff   : > { %v2261_v38 = vunpack.i.h.bf16 %v2259_v53  ;;  %v2260_v45 = vunpack.i.l.bf16 %v2259_v53 }
 0x201   : > { %v1851_v13 = vrot.slane %v2261_v38, %v1584_v54  ;;  %v1847_v61 = vrot.slane %v2260_v45, %v1579_v50 }
 0x202   : > { %v3155_v19 = vpop.permute.xlu1 %2263  ;;  %v3157_v39 = vpop.permute.xlu0 %2268 }
 0x203   : > { %v2266_v52 = vunpack.i.h.bf16 %v3155_v19  ;;  %v2265_v14 = vunpack.i.l.bf16 %v3155_v19  ;;  %v2270_v30 = vunpack.i.l.bf16 %v3157_v39  ;;  %v2271_v48 = vunpack.i.h.bf16 %v3157_v39 }
 0x204   : > { %v3236_v39 = vsub.s32 %v1679_v6, %v3511_v1 }
 0x205   : > { %v1585_v53 = vrot.slane %v2266_v52, %v1584_v54  ;;  %v1580_v19 = vrot.slane %v2265_v14, %v1579_v50  ;;  %v1768_v24 = vrot.slane %v2271_v48, %v1579_v50 }
 0x206   : > { %v3159_v20 = vpop.permute.xlu1 %2273  ;;  %v3161_v51 = vpop.permute.xlu0 %2278 }
 0x207   : > { %v2276_v35 = vunpack.i.h.bf16 %v3159_v20  ;;  %v2275_v60 = vunpack.i.l.bf16 %v3159_v20  ;;  %v2281_v44 = vunpack.i.h.bf16 %v3161_v51  ;;  %v2280_v63 = vunpack.i.l.bf16 %v3161_v51 }
 0x208   : > { %v1698_v20 = vrot.slane %v2270_v30, %v1591_v58  ;;  %v1694_v51 = vsel %vm1586_vm2, %v1693_v34, %v1689_v57  ;;  %v1587_v15 = vsel %vm1586_vm2, %v1585_v53, %v1580_v19 }
 0x209   : > { %v1856_v26 = vrot.slane %v2276_v35, %v1591_v58  ;;  %v1772_v27 = vrot.slane %v2275_v60, %v1584_v54  ;;  %v1703_v40 = vrot.slane %v2281_v44, %v3182_v55  ;;  %v1592_v8 = vrot.slane %v2280_v63, %v1591_v58 }
 0x20a   : > { %v3163_v4 = vpop.permute.xlu1 %2283  ;;  %v1699_v54 = vsel %vm1593_vm3, %v1698_v20, %v1694_v51 }
 0x20b   : > { %v2286_v43 = vunpack.i.h.bf16 %v3163_v4  ;;  %v2285_v47 = vunpack.i.l.bf16 %v3163_v4  ;;  %v1852_v4 = vsel %vm1586_vm2, %v1851_v13, %v1847_v61  ;;  %v1704_v18 = vsel %vm1600_vm4, %v1703_v40, %v1699_v54 }
 0x20c   : > { %v1857_v59 = vsel %vm1593_vm3, %v1856_v26, %v1852_v4  ;;  %v1594_v52 = vsel %vm1593_vm3, %v1592_v8, %v1587_v15 }
 0x20d   : > { %v1861_v28 = vrot.slane %v2286_v43, %v3182_v55  ;;  %v1777_v1 = vrot.slane %v2285_v47, %v1591_v58 }
 0x20e   : > { %v3165_v23 = vpop.permute.xlu0 %2288 }
 0x20f   : > { %v2290_v36 = vunpack.i.l.bf16 %v3165_v23  ;;  %v2291_v33 = vunpack.i.h.bf16 %v3165_v23  ;;  %v1773_v23 = vsel %vm1586_vm2, %v1772_v27, %v1768_v24  ;;  %v1862_v35 = vsel %vm1600_vm4, %v1861_v28, %v1857_v59 }
 0x210   : > { %v1778_v56 = vsel %vm1593_vm3, %v1777_v1, %v1773_v23  ;;  %vm1999_vm2 = vcmask 828416  }
 0x211   : > { %v1599_v38 = vrot.slane %v2290_v36, %v3182_v55  ;;  %v1708_v14 = vrot.slane %v2291_v33, %v3185_v11 }
 0x212   : > { %v3167_v5 = vpop.permute.xlu1 %2293  ;;  %v3170_v29 = vpop.permute.xlu0 %2298 }
 0x213   : > { %v2296_v32 = vunpack.i.h.bf16 %v3167_v5  ;;  %v2295_v7 = vunpack.i.l.bf16 %v3167_v5  ;;  %v2300_v3 = vunpack.i.l.bf16 %v3170_v29  ;;  %v2301_v58 = vunpack.i.h.bf16 %v3170_v29 }
 0x215   : > { %v1866_v6 = vrot.slane %v2296_v32, %v3185_v11  ;;  %v1782_v29 = vrot.slane %v2295_v7, %v3182_v55  ;;  %v1606_v57 = vrot.slane %v2300_v3, %v3185_v11  ;;  %v1713_v61 = vrot.slane %v2301_v58, %v3188_v9 }
 0x216   : > { %v3172_v12 = vpop.permute.xlu1 %2303  ;;  %v1709_v55 = vsel %vm1607_vm5, %v1708_v14, %v1704_v18 }
 0x217   : > { %v2306_v5 = vunpack.i.h.bf16 %v3172_v12  ;;  %v2305_v30 = vunpack.i.l.bf16 %v3172_v12  ;;  %v1601_v12 = vsel %vm1600_vm4, %v1599_v38, %v1594_v52  ;;  %v1867_v47 = vsel %vm1607_vm5, %v1866_v6, %v1862_v35 }
 0x218   : > { %v1783_v51 = vsel %vm1600_vm4, %v1782_v29, %v1778_v56  ;;  %v1608_v27 = vsel %vm1607_vm5, %v1606_v57, %v1601_v12 }
 0x219   : > { %v1871_v19 = vrot.slane %v2306_v5, %v3188_v9 }
 0x21a   : > { %v3174_v42 = vpop.permute.xlu0 %2308 }
 0x21b   : > { %v2310_v34 = vunpack.i.l.bf16 %v3174_v42  ;;  %v2311_v60 = vunpack.i.h.bf16 %v3174_v42  ;;  %v1787_v42 = vrot.slane %v2305_v30, %v3185_v11  ;;  %v1714_v11 = vsel %vm1614_vm6, %v1713_v61, %v1709_v55 }
 0x21c   : > { %v1872_v8 = vsel %vm1614_vm6, %v1871_v19, %v1867_v47 }
 0x21d   : > { %v1613_v20 = vrot.slane %v2310_v34, %v3188_v9  ;;  %v1718_v40 = vrot.slane %v2311_v60, %v3191_v46 }
 0x21e   : > { %v3176_v41 = vpop.permute.xlu1 %2313  ;;  %v3202_v49 = vpop.permute.xlu0 %2318 }
 0x21f   : > { %v2316_v44 = vunpack.i.h.bf16 %v3176_v41  ;;  %v2315_v48 = vunpack.i.l.bf16 %v3176_v41  ;;  %v2320_v63 = vunpack.i.l.bf16 %v3202_v49  ;;  %v2321_v43 = vunpack.i.h.bf16 %v3202_v49 }
 0x220   : > { %v1615_v1 = vsel %vm1614_vm6, %v1613_v20, %v1608_v27  ;;  %v1719_v7 = vsel %vm1621_vm7, %v1718_v40, %v1714_v11 }
 0x221   : > { %v1876_v36 = vrot.slane %v2316_v44, %v3191_v46  ;;  %v1792_v49 = vrot.slane %v2315_v48, %v3188_v9  ;;  %v1620_v4 = vrot.slane %v2320_v63, %v3191_v46  ;;  %v1723_v33 = vrot.slane %v2321_v43, %v3194_v2 }
 0x222   : > { %v3212_v22 = vpop.permute.xlu1 %2323 }
 0x223   : > { %v2326_v26 = vunpack.i.h.bf16 %v3212_v22  ;;  %v2325_v41 = vunpack.i.l.bf16 %v3212_v22  ;;  %v1788_v22 = vsel %vm1607_vm5, %v1787_v42, %v1783_v51  ;;  %v1877_v3 = vsel %vm1621_vm7, %v1876_v36, %v1872_v8 }
 0x224   : > { %v1622_v38 = vsel %vm1621_vm7, %v1620_v4, %v1615_v1 }
 0x225   : > { %v1881_v32 = vrot.slane %v2326_v26, %v3194_v2  ;;  %v1797_v9 = vrot.slane %v2325_v41, %v3191_v46  ;;  %v1724_v46 = vsel %vm1628_vm8, %v1723_v33, %v1719_v7 }
 0x226   : > { %v3226_v16 = vpop.permute.xlu0 %2328 }
 0x227   : > { %v2330_v24 = vunpack.i.l.bf16 %v3226_v16  ;;  %v2331_v15 = vunpack.i.h.bf16 %v3226_v16  ;;  %v1793_v16 = vsel %vm1614_vm6, %v1792_v49, %v1788_v22  ;;  %v1882_v35 = vsel %vm1628_vm8, %v1881_v32, %v1877_v3 }
 0x228   : > { %v1798_v56 = vsel %vm1621_vm7, %v1797_v9, %v1793_v16 }
 0x229   : > { %v1627_v58 = vrot.slane %v2330_v24, %v3194_v2  ;;  %v1728_v14 = vrot.slane %v2331_v15, %v3197_v21 }
 0x22a   : > { %v3230_v62 = vpop.permute.xlu1 %2333  ;;  %v3250_v50 = vpop.permute.xlu0 %2338 }
 0x22b   : > { %v2336_v54 = vunpack.i.h.bf16 %v3230_v62  ;;  %v2335_v23 = vunpack.i.l.bf16 %v3230_v62  ;;  %v2340_v18 = vunpack.i.l.bf16 %v3250_v50  ;;  %v2341_v52 = vunpack.i.h.bf16 %v3250_v50 }
 0x22c   : > { %v1729_v63 = vsel %vm1635_vm9, %v1728_v14, %v1724_v46 }
 0x22d   : > { %v1886_v6 = vrot.slane %v2336_v54, %v3197_v21  ;;  %v1802_v29 = vrot.slane %v2335_v23, %v3194_v2  ;;  %v1634_v57 = vrot.slane %v2340_v18, %v3197_v21  ;;  %v1733_v12 = vrot.slane %v2341_v52, %v3200_v31 }
 0x22e   : > { %v3256_v45 = vpop.permute.xlu1 %2343 }
 0x22f   : > { %v2346_v5 = vunpack.i.h.bf16 %v3256_v45  ;;  %v2345_v30 = vunpack.i.l.bf16 %v3256_v45  ;;  %v1629_v45 = vsel %vm1628_vm8, %v1627_v58, %v1622_v38 }
 0x230   : > { %v1636_v41 = vsel %vm1635_vm9, %v1634_v57, %v1629_v45 }
 0x231   : > { %v1891_v55 = vrot.slane %v2346_v5, %v3200_v31  ;;  %v1807_v19 = vrot.slane %v2345_v30, %v3197_v21  ;;  %v1734_v21 = vsel %vm1642_vm10, %v1733_v12, %v1729_v63 }
 0x232   : > { %v3270_v13 = vpop.permute.xlu0 %2348 }
 0x233   : > { %v2350_v34 = vunpack.i.l.bf16 %v3270_v13  ;;  %v2351_v60 = vunpack.i.h.bf16 %v3270_v13  ;;  %v1887_v13 = vsel %vm1635_vm9, %v1886_v6, %v1882_v35 }
 0x234   : > { %v1892_v49 = vsel %vm1642_vm10, %v1891_v55, %v1887_v13 }
 0x235   : > { %v1641_v43 = vrot.slane %v2350_v34, %v3200_v31  ;;  %v1738_v51 = vrot.slane %v2351_v60, %v3205_v0 }
 0x236   : > { %v3276_v53 = vpop.permute.xlu1 %2353  ;;  %v2359_v28 = vpop.permute.xlu0 %2358 }
 0x237   : > { %v2356_v44 = vunpack.i.h.bf16 %v3276_v53  ;;  %v2355_v61 = vunpack.i.l.bf16 %v3276_v53  ;;  %v2360_v48 = vunpack.i.l.bf16 %v2359_v28  ;;  %v2361_v2 = vunpack.i.h.bf16 %v2359_v28 }
 0x238   : > { %v1803_v53 = vsel %vm1628_vm8, %v1802_v29, %v1798_v56  ;;  %v1643_v33 = vsel %vm1642_vm10, %v1641_v43, %v1636_v41  ;;  %v1739_v32 = vsel %vm1649_vm11, %v1738_v51, %v1734_v21 }
 0x239   : > { %v1896_v27 = vrot.slane %v2356_v44, %v3205_v0  ;;  %v1812_v40 = vrot.slane %v2355_v61, %v3200_v31  ;;  %v1648_v36 = vrot.slane %v2360_v48, %v3205_v0  ;;  %v1808_v4 = vsel %vm1635_vm9, %v1807_v19, %v1803_v53 }
 0x23a   : > { %v2364_v59 = vpop.permute.xlu1 %2363  ;;  %v1743_v24 = vrot.slane %v2361_v2, %v3208_v25 }
 0x23b   : > { %v2366_v47 = vunpack.i.h.bf16 %v2364_v59  ;;  %v2365_v20 = vunpack.i.l.bf16 %v2364_v59  ;;  %v1897_v9 = vsel %vm1649_vm11, %v1896_v27, %v1892_v49  ;;  %v1813_v7 = vsel %vm1642_vm10, %v1812_v40, %v1808_v4 }
 0x23c   : > { %v1650_v3 = vsel %vm1649_vm11, %v1648_v36, %v1643_v33 }
 0x23d   : > { %v1901_v15 = vrot.slane %v2366_v47, %v3208_v25  ;;  %v1817_v28 = vrot.slane %v2365_v20, %v3205_v0  ;;  %v1744_v0 = vsel %vm1656_vm12, %v1743_v24, %v1739_v32 }
 0x23e   : > { %v2369_v62 = vpop.permute.xlu0 %2368 }
 0x23f   : > { %v2370_v11 = vunpack.i.l.bf16 %v2369_v62  ;;  %v2371_v8 = vunpack.i.h.bf16 %v2369_v62  ;;  %v1902_v46 = vsel %vm1656_vm12, %v1901_v15, %v1897_v9  ;;  %v1818_v14 = vsel %vm1649_vm11, %v1817_v28, %v1813_v7  ;;  %v1286_v9 = vld [vmem:[#allocation2] sm:$0x3] }
 0x241   : > { %v1655_v23 = vrot.slane %v2370_v11, %v3208_v25  ;;  %v1748_v16 = vrot.slane %v2371_v8, %v3215_v17 }
 0x242   : > { %v2374_v50 = vpop.permute.xlu1 %2373 }
 0x243   : > { %v2376_v1 = vunpack.i.h.bf16 %v2374_v50  ;;  %v2375_v54 = vunpack.i.l.bf16 %v2374_v50  ;;  %v1657_v34 = vsel %vm1656_vm12, %v1655_v23, %v1650_v3  ;;  %v1749_v60 = vsel %vm1663_vm13, %v1748_v16, %v1744_v0  ;;  %v2128_v3 = vld [vmem:[%s3442_s3] ss:$0 sm:$0xff] (!%p2127_p12) }
 0x245   : > { %v1906_v5 = vrot.slane %v2376_v1, %v3215_v17  ;;  %v1822_v62 = vrot.slane %v2375_v54, %v3208_v25 }
 0x246   : > { %v3328_v42 = vpop.permute.xlu0 %2378 }
 0x247   : > { %v2381_v59 = vunpack.i.h.bf16 %v3328_v42  ;;  %v2380_v56 = vunpack.i.l.bf16 %v3328_v42  ;;  %v1907_v25 = vsel %vm1663_vm13, %v1906_v5, %v1902_v46  ;;  %v1823_v19 = vsel %vm1656_vm12, %v1822_v62, %v1818_v14 }
 0x249   : > { %v1753_v35 = vrot.slane %v2381_v59, %v3218_v10  ;;  %v1662_v2 = vrot.slane %v2380_v56, %v3215_v17 }
 0x24a   : > { %v2384_v26 = vpop.permute.xlu1 %2383 }
 0x24b   : > { %v2386_v18 = vunpack.i.h.bf16 %v2384_v26  ;;  %v2385_v6 = vunpack.i.l.bf16 %v2384_v26  ;;  %v1754_v13 = vsel %vm1670_vm14, %v1753_v35, %v1749_v60 }
 0x24d   : > { %v1911_v50 = vrot.slane %v2386_v18, %v3218_v10  ;;  %v1827_v42 = vrot.slane %v2385_v6, %v3215_v17 }
 0x24e   : > { %v2389_v22 = vpop.permute.xlu0 %2388 }
 0x24f   : > { %v2391_v38 = vunpack.i.h.bf16 %v2389_v22  ;;  %v2390_v29 = vunpack.i.l.bf16 %v2389_v22  ;;  %v1912_v26 = vsel %vm1670_vm14, %v1911_v50, %v1907_v25  ;;  %v1828_v49 = vsel %vm1663_vm13, %v1827_v42, %v1823_v19 }
 0x251   : > { %v1758_v44 = vrot.slane %v2391_v38, %v3233_v37  ;;  %v1669_v43 = vrot.slane %v2390_v29, %v3218_v10 }
 0x252   : > { %v2394_v31 = vpop.permute.xlu1 %2393 }
 0x253   : > { %v2396_v58 = vunpack.i.h.bf16 %v2394_v31  ;;  %v2395_v57 = vunpack.i.l.bf16 %v2394_v31  ;;  %v1759_v27 = vsel %vm1677_vm15, %v1758_v44, %v1754_v13 }
 0x255   : > { %v1916_v45 = vrot.slane %v2396_v58, %v3233_v37  ;;  %v1832_v47 = vrot.slane %v2395_v57, %v3218_v10  ;;  %v1664_v10 = vsel %vm1663_vm13, %v1662_v2, %v1657_v34 }
 0x256   : > { %v2399_v52 = vpop.permute.xlu0 %2398  ;;  %v1671_v24 = vsel %vm1670_vm14, %v1669_v43, %v1664_v10 }
 0x257   : > { %v2401_v30 = vunpack.i.h.bf16 %v2399_v52  ;;  %v2400_v12 = vunpack.i.l.bf16 %v2399_v52  ;;  %v1917_v21 = vsel %vm1677_vm15, %v1916_v45, %v1912_v26 }
 0x259   : > { %v1763_v48 = vrot.slane %v2401_v30, %v3236_v39  ;;  %v1676_v53 = vrot.slane %v2400_v12, %v3233_v37 }
 0x25a   : > { %v2404_v61 = vpop.permute.xlu1 %2403 }
 0x25b   : > { %v2406_v63 = vunpack.i.h.bf16 %v2404_v61  ;;  %v2405_v55 = vunpack.i.l.bf16 %v2404_v61  ;;  %v1764_v36 = vsel %vm1684_vm0, %v1763_v48, %v1759_v27  ;;  %v1678_v33 = vsel %vm1677_vm15, %v1676_v53, %v1671_v24 }
 0x25d   : > { %v1921_v20 = vrot.slane %v2406_v63, %v3236_v39  ;;  %v1837_v41 = vrot.slane %v2405_v55, %v3233_v37  ;;  %v1833_v37 = vsel %vm1670_vm14, %v1832_v47, %v1828_v49 }
 0x25e   : > { %v2409_v51 = vpop.permute.xlu0 %2408 }
 0x25f   : > { %v2411_v17 = vunpack.i.h.bf16 %v2409_v51  ;;  %v2410_v40 = vunpack.i.l.bf16 %v2409_v51  ;;  %v1922_v11 = vsel %vm1684_vm0, %v1921_v20, %v1917_v21  ;;  %v1838_v15 = vsel %vm1677_vm15, %v1837_v41, %v1833_v37 }
 0x260   : > { %v1925_v4 = vsel %vm1923_vm1, %v1922_v11, %v1764_v36 }
 0x261   : > { %v1842_v8 = vrot.slane %v2411_v17, %v3236_v39  ;;  %v1683_v22 = vrot.slane %v2410_v40, %v3236_v39  ;;  %1992 = vmatprep.mubr.f32.mxu0 %v1925_v4 }
 0x263   : > { %v1685_v28 = vsel %vm1684_vm0, %v1683_v22, %v1678_v33  ;;  %v1843_v1 = vsel %vm1684_vm0, %v1842_v8, %v1838_v15 }
 0x264   : > { %v1924_v31 = vsel %vm1923_vm1, %v1843_v1, %v1685_v28 }
 0x265   : > { %1993 = vmatmul.mubr.f32.vlgmr.msra.gmra.mrb[0].mxu0 %v1924_v31 }
 0x338   : > { %v2166_v32 = vpop.f32.mrb[0].mxu0  ;;  %2004 = sbr.rel (%p2127_p12) target bundleno = 841 (0x349), region = 82 }
 0x339   : > { %v2167_v54 = vpop.f32.mrb[1].mxu0 }
 0x33a   : > { %v2168_v59 = vadd.f32 %v2167_v54, %v2166_v32 }
 0x33c   : > { %v1998_v7 = vadd.f32 %v2168_v59, %v1286_v9 }
 0x33e   : > { %2000 = vst.msk [vmem:[#allocation2] sm:$0x3] %vm1999_vm2, %v1998_v7 }
 0x345   : > { %v2005_v39 = vld [vmem:[#allocation2] sm:$0x3] }
 0x346   : > { %v2013_v23 = vadd.f32 %v2128_v3, %v2005_v39 }
 0x348   : > { %2014 = vst.msk [vmem:[#allocation4] sm:$0x3] %vm1999_vm2, %v2013_v23 }
 0x349 PF: > { %p3398_p13 = scmp.eq.s32.totalorder %s2113_s20, 6  ;;  %s2484_s29 = smov [#allocation4]  }
 0x34a   : > { %s2024_s30 = sshll.u32 %s2484_s29, 4  ;;  %s2025_s30 = int_to_ptr.vmem [resolvable:$true] %s2024_s30 }
 0x34b   : > { %s2412_s17 = scalar_lea.vmem %s2025_s30, 32  ;;  %p2419_p3 = scmp.lt.s32.totalorder %s2025_s30, %s2025_s30 }
 0x34c   : > { %p2413_p0 = scmp.ne.s32.totalorder %s2025_s30, %s2412_s17  ;;  %p2420_p4 = scmp.lt.s32.totalorder %s2412_s17, %s2412_s17 }
 0x34e   : > { %p2414_p1 = pnand %p2413_p0, %p3398_p13  ;;  %p2421_p5 = por %p2420_p4, %p2419_p3 }
 0x350   : > { %p2415_p2 = pneg %p2414_p1 }
 0x352   : > { %p2422_p6 = pnand %p2421_p5, %p2415_p2 }
 0x354   : > { %2425 = shalt.err (!%p2422_p6)
}
 0x355   : > { %s2426_s20 = scalar_lea.hbm %s3443_s4, 32 }
 0x356   : > { %p2427_p7 = scmp.ne.s32.totalorder %s3443_s4, %s2426_s20  ;;  %p2432_p10 = scmp.lt.u32.totalorder %s2426_s20, %s3443_s4 }
 0x358   : > { %p2428_p8 = pnand %p2427_p7, %p3398_p13 }
 0x35a   : > { %p2429_p9 = pneg %p2428_p8 }
 0x35c   : > { %p2434_p11 = pnand %p2432_p10, %p2429_p9 }
 0x35e   : > { %2437 = shalt.err (!%p2434_p11)
}
 0x35f   : > { %2202 = dma.vmem_to_hbm [thread:$0]  (%p3398_p13), %s2025_s30, 32, %s3443_s4, [#allocation5]  }
 0x360   : > { %2459 = dma.done.wait (%p3398_p13), [#allocation5], 32  }
 0x361   : > { %2461 = vsyncadd (%p3398_p13), [#allocation5], 4294967264 }
 0x362 PF: > { %s15_s19 = sadd.s32 1, %s2480_s19   ;;  %s3513_s15 = smov %s2468_s16 }
 0x363   : > { %p12_p12 = scmp.ge.s32.totalorder %s15_s19, 9   ;;  %s3514_s16 = smov %s2546_s24 }
 0x364   : > { %s3515_s17 = smov %s2476_s18  ;;  %s3516_s18 = smov %s3518_s21 }
 0x365   :  { %14 = sbr.rel (!%p12_p12) target bundleno = 3 (0x3), region = 121 }
 0x36c   :  { %2037 = vsyncpa [#allocation5], 1 }
 0x36d   :  { %2039 = vsyncpa [#allocation5 + $0x1], 1 }

</bundles_post_ra>
